<compile_context>
chip_gen: v6e
topology: v6e:2x2x1
jax: 0.10.0
libtpu: 0.0.40
codegen_flags: <defaults>
</compile_context>

<pallas_src>
import jax
import jax.numpy as jnp
import numpy as np
from jax.experimental import pallas as pl
from jax.experimental.pallas import tpu as pltpu

HIDDEN_LSTM = 128     # hidden_size_lstm in ModelSmall
NUM_LAYERS  = 12      # LSTM pooling runs over 12 transformer layers
H_IN        = 64      # "config.hidden_size" (shrunk for this synthetic test)
BATCH       = 2
SEQ         = 8
B_PAD       = 8       # batch padded to one sublane group (B=2 wastes 75% of each
                      # vreg row anyway; padding makes every row slice 8-aligned)
HEAD_OUT    = 6


def model_small_kernel(x_ref, lstm_ref, head_ref, out_ref, gbuf):
    """x_ref:    (T*B_PAD, H_IN)        bf16  -- time-major, batch sublane-padded
       lstm_ref: (H_IN + HL + 1, 8*HL)  bf16  -- [wih_f|wih_b] ; whh_f (cols :4HL) ; [b_f|b_b]
       head_ref: (4*HL + 3, HL)         bf16  -- w1 ; w2(pad) ; w3(pad) ; b1 ; b2(pad) ; b3(pad)
       out_ref:  (B_PAD, HL)            f32   -- lane-dense, cols 6: are zero
       gbuf:     (T*B_PAD, 8*HL)        f32   -- VMEM scratch for precomputed gates
    """
    f32, bf16 = jnp.float32, jnp.bfloat16
    HL = HIDDEN_LSTM
    T = NUM_LAYERS
    TB, HIN = x_ref.shape
    BP = TB // T                                   # sublane-padded batch (8)

    # ---- hoisted input projection: one bf16 MXU matmul produces forward gates for
    # every timestep AND the reverse gates (we only use reverse at t = T-1); the
    # bias row is added once here instead of 12x inside the recurrence. ----
    wih_fb = lstm_ref[0:HIN, :]                                    # (HIN, 8*HL) bf16
    b_fb = lstm_ref[HIN + HL:HIN + HL + 1, :].astype(f32)          # (1, 8*HL)
    gbuf[...] = jnp.dot(x_ref[...], wih_fb,
                        preferred_element_type=f32) + b_fb          # (T*BP, 8*HL)

    whh_f = lstm_ref[HIN:HIN + HL, 0:4 * HL]                        # (HL, 4*HL) bf16

    def lstm_cell(gates, c):
        # PyTorch gate order: i, f, g, o.  All elementwise math in f32.
        i = jax.nn.sigmoid(gates[:, 0 * HL:1 * HL])
        f = jax.nn.sigmoid(gates[:, 1 * HL:2 * HL])
        g = jnp.tanh(gates[:, 2 * HL:3 * HL])
        o = jax.nn.sigmoid(gates[:, 3 * HL:4 * HL])
        c_new = f * c + i * g
        return o * jnp.tanh(c_new), c_new

    # ---- forward recurrence: static unrolled loop (LLO visibility); each step is
    # only one small bf16 dot + VPU/EUP work.  t == 0 has h == 0, skip its dot. ----
    h, c = lstm_cell(gbuf[0:BP, 0:4 * HL], jnp.zeros((BP, HL), f32))
    for t in range(1, T):
        g_t = gbuf[t * BP:(t + 1) * BP, 0:4 * HL] + jnp.dot(
            h.astype(bf16), whh_f, preferred_element_type=f32)
        h, c = lstm_cell(g_t, c)
    h_fwd_last = h

    # ---- reverse direction: output at position T-1 is one step from the zero state
    # over x[T-1] only; h == 0 so the whh_b contribution is identically zero and
    # whh_b is never needed in the kernel. ----
    h_bwd_last, _ = lstm_cell(gbuf[(T - 1) * BP:T * BP, 4 * HL:8 * HL],
                              jnp.zeros((BP, HL), f32))

    feat = jnp.concatenate([h_fwd_last, h_bwd_last], axis=-1)       # (BP, 2*HL) f32

    # ---- MLP head (Dropout layers are identity in eval mode).  w2/w3/b2/b3 are
    # zero-padded to 128 lanes so every dot output and the final store are
    # lane-dense; the padded columns stay exactly zero through ReLU. ----
    w1 = head_ref[0:2 * HL, :]                                      # (256,128) bf16
    w2 = head_ref[2 * HL:3 * HL, :]                                 # (128,128) bf16
    w3 = head_ref[3 * HL:4 * HL, :]                                 # (128,128) bf16
    biases = head_ref[4 * HL:4 * HL + 3, :].astype(f32)             # (3,128)  f32

    y = jnp.dot(feat.astype(bf16), w1, preferred_element_type=f32) + biases[0:1, :]
    y = jnp.maximum(y, 0.0)
    y = jnp.dot(y.astype(bf16), w2, preferred_element_type=f32) + biases[1:2, :]
    y = jnp.maximum(y, 0.0)
    y = jnp.dot(y.astype(bf16), w3, preferred_element_type=f32) + biases[2:3, :]
    out_ref[...] = y                                                # (BP, 128)


def pack_params(p):
    """Pack all weights (bf16) into two DMA slabs consumed by the kernel."""
    bf = jnp.bfloat16
    HL = HIDDEN_LSTM

    # LSTM slab (1024 lanes): [wih_f | wih_b] ; whh_f zero-padded to 1024 cols ; [b_f | b_b]
    wih_fb = jnp.concatenate([p["wih_f"], p["wih_b"]], axis=1)          # (H_IN, 8*HL)
    whh_pad = jnp.pad(p["whh_f"], ((0, 0), (0, 4 * HL)))                # (HL, 8*HL)
    b_fb = jnp.concatenate([p["b_f"], p["b_b"]], axis=1)                # (1, 8*HL)
    lstm_slab = jnp.concatenate([wih_fb, whh_pad, b_fb], axis=0).astype(bf)

    # Head slab (128 lanes): w1 ; w2 pad ; w3 pad ; b1 ; b2 pad ; b3 pad
    w2p = jnp.pad(p["w2"], ((0, 0), (0, HL - 32)))                      # (128,128)
    w3p = jnp.pad(p["w3"], ((0, HL - 32), (0, HL - HEAD_OUT)))          # (128,128)
    b2p = jnp.pad(p["b2"], ((0, 0), (0, HL - 32)))                      # (1,128)
    b3p = jnp.pad(p["b3"], ((0, 0), (0, HL - HEAD_OUT)))                # (1,128)
    head_slab = jnp.concatenate(
        [p["w1"], w2p, w3p, p["b1"], b2p, b3p], axis=0).astype(bf)      # (515,128)

    return {"lstm": lstm_slab, "head": head_slab}


def model_small_forward(all_hidden_states, packed):
    """all_hidden_states: (NUM_LAYERS+1, B, S, H_IN) stacked hidden states
    (index 0 = embedding output).  LSTMPooling consumes the CLS token of layers
    1..NUM_LAYERS as a length-NUM_LAYERS sequence."""
    cls = all_hidden_states[1:, :, 0, :]                  # (T, B, H_IN), time-major
    T, B, HIN = cls.shape
    assert B <= B_PAD
    # Pad batch to one sublane group and ship activations as bf16 (MXU-native).
    x = jnp.pad(cls.astype(jnp.float32), ((0, 0), (0, B_PAD - B), (0, 0)))
    x_flat = x.reshape(T * B_PAD, HIN).astype(jnp.bfloat16)

    vmem = pl.BlockSpec(memory_space=pltpu.MemorySpace.VMEM)
    out = pl.pallas_call(
        model_small_kernel,
        out_shape=jax.ShapeDtypeStruct((B_PAD, HIDDEN_LSTM), jnp.float32),
        in_specs=[vmem, vmem, vmem],
        out_specs=vmem,
        scratch_shapes=[pltpu.VMEM((NUM_LAYERS * B_PAD, 8 * HIDDEN_LSTM),
                                   jnp.float32)],
        compiler_params=pltpu.CompilerParams(vmem_limit_bytes=16 * 1024 * 1024),
    )(x_flat, packed["lstm"], packed["head"])
    return out[:B, :HEAD_OUT]


def init_params(key):
    HL = HIDDEN_LSTM
    ks = jax.random.split(key, 12)

    def nrm(k, shape, std):
        return (std * jax.random.normal(k, shape)).astype(jnp.float32)

    # Bidirectional LSTM (PyTorch stores (4*HL, in); pre-transposed to (in, 4*HL)).
    return {
        "wih_f": nrm(ks[0], (H_IN, 4 * HL), 0.05),
        "whh_f": nrm(ks[1], (HL, 4 * HL), 0.05),
        "b_f":   nrm(ks[2], (1, 4 * HL), 0.05),    # b_ih + b_hh combined
        "wih_b": nrm(ks[3], (H_IN, 4 * HL), 0.05),
        # whh_b exists in the PyTorch module but its contribution at the pooled
        # position is dot(0, whh_b) == 0, so it is never used by the kernel.
        "b_b":   nrm(ks[4], (1, 4 * HL), 0.05),
        # Linear heads: _init_weights -> weight ~ N(0, 0.01); biases small random
        # (PyTorch default bias init is nonzero).
        "w1": nrm(ks[5], (2 * HL, HL), 0.01),
        "b1": nrm(ks[6], (1, HL), 0.02),
        "w2": nrm(ks[7], (HL, 32), 0.01),
        "b2": nrm(ks[8], (1, 32), 0.02),
        "w3": nrm(ks[9], (32, HEAD_OUT), 0.01),
        "b3": nrm(ks[10], (1, HEAD_OUT), 0.02),
    }


def reference_forward(all_hidden_states, p):
    """Pure-JAX reference with the same math as the kernel (bf16 MXU operands,
    f32 accumulation and f32 elementwise)."""
    HL = HIDDEN_LSTM
    bf = jnp.bfloat16
    x = all_hidden_states[1:, :, 0, :].astype(bf)          # (T, B, H_IN)
    T, B, _ = x.shape

    def dot(a, b):
        return jnp.dot(a, b, preferred_element_type=jnp.float32)

    def cell(g, c):
        i = jax.nn.sigmoid(g[:, :HL])
        f = jax.nn.sigmoid(g[:, HL:2 * HL])
        gg = jnp.tanh(g[:, 2 * HL:3 * HL])
        o = jax.nn.sigmoid(g[:, 3 * HL:])
        c = f * c + i * gg
        return o * jnp.tanh(c), c

    wih_f = p["wih_f"].astype(bf); whh_f = p["whh_f"].astype(bf)
    wih_b = p["wih_b"].astype(bf)
    b_f = p["b_f"].astype(bf).astype(jnp.float32)
    b_b = p["b_b"].astype(bf).astype(jnp.float32)

    h = jnp.zeros((B, HL), jnp.float32); c = jnp.zeros((B, HL), jnp.float32)
    for t in range(T):
        g = dot(x[t], wih_f) + b_f + dot(h.astype(bf), whh_f)
        h, c = cell(g, c)
    h_b, _ = cell(dot(x[T - 1], wih_b) + b_b,
                  jnp.zeros((B, HL), jnp.float32))
    feat = jnp.concatenate([h, h_b], axis=-1)

    w1 = p["w1"].astype(bf); w2 = p["w2"].astype(bf); w3 = p["w3"].astype(bf)
    b1 = p["b1"].astype(bf).astype(jnp.float32)
    b2 = p["b2"].astype(bf).astype(jnp.float32)
    b3 = p["b3"].astype(bf).astype(jnp.float32)
    y = jnp.maximum(dot(feat.astype(bf), w1) + b1, 0.0)
    y = jnp.maximum(dot(y.astype(bf), w2) + b2, 0.0)
    return dot(y.astype(bf), w3) + b3


if __name__ == "__main__":
    key = jax.random.PRNGKey(0)
    k_param, k_x = jax.random.split(key)

    params = init_params(k_param)
    packed = pack_params(params)         # weight slabs packed once, reused per call

    # Stacked deberta hidden states: (num_layers + 1, batch, seq, hidden)
    all_hidden_states = jax.random.normal(
        k_x, (NUM_LAYERS + 1, BATCH, SEQ, H_IN), dtype=jnp.float32)

    out = model_small_forward(all_hidden_states, packed)
    out = jax.block_until_ready(out)

    ref = reference_forward(all_hidden_states, params)
    np.testing.assert_allclose(np.asarray(out), np.asarray(ref),
                               rtol=1e-3, atol=1e-5)
    assert out.shape == (BATCH, HEAD_OUT)
    print("KERNEL_OK")
</pallas_src>

<mosaic_0001>
module attributes {stable_mosaic.version = 11 : i64} {
  func.func @model_small_kernel(%arg0: memref<96x64xbf16, #tpu.memory_space<vmem>>, %arg1: memref<193x1024xbf16, #tpu.memory_space<vmem>>, %arg2: memref<515x128xbf16, #tpu.memory_space<vmem>>, %arg3: memref<8x128xf32, #tpu.memory_space<vmem>>, %arg4: memref<96x1024xf32, #tpu.memory_space<vmem>>) attributes {dimension_semantics = [], scalar_prefetch = 0 : i64, scratch_operands = 1 : i64, tpu.core_type = #tpu.core_type<tc>} {
    %c0 = arith.constant 0 : index
    %c0_0 = arith.constant 0 : index
    %0 = vector.load %arg1[%c0, %c0_0] : memref<193x1024xbf16, #tpu.memory_space<vmem>>, vector<64x1024xbf16>
    %c192 = arith.constant 192 : index
    %c0_1 = arith.constant 0 : index
    %1 = vector.load %arg1[%c192, %c0_1] : memref<193x1024xbf16, #tpu.memory_space<vmem>>, vector<1x1024xbf16>
    %2 = arith.extf %1 : vector<1x1024xbf16> to vector<1x1024xf32>
    %c0_2 = arith.constant 0 : index
    %c0_3 = arith.constant 0 : index
    %3 = vector.load %arg0[%c0_2, %c0_3] : memref<96x64xbf16, #tpu.memory_space<vmem>>, vector<96x64xbf16>
    %cst = arith.constant dense<0.000000e+00> : vector<96x1024xf32>
    %4 = tpu.matmul %3, %0, %cst {dimension_numbers = #tpu.dot_dimension_numbers<[1], [0], [0], [1], [0, 0, 1, 1], [], []>} : vector<96x64xbf16>, vector<64x1024xbf16>, vector<96x1024xf32> -> vector<96x1024xf32>
    %5 = vector.broadcast %2 : vector<1x1024xf32> to vector<96x1024xf32>
    %6 = arith.addf %4, %5 : vector<96x1024xf32>
    %c0_4 = arith.constant 0 : index
    %c0_5 = arith.constant 0 : index
    %7 = vector.load %arg4[%c0_4, %c0_5] : memref<96x1024xf32, #tpu.memory_space<vmem>>, vector<96x1024xf32>
    tpu.vector_store %arg4[%c0_4, %c0_5], %6 {strides = array<i32>} : memref<96x1024xf32, #tpu.memory_space<vmem>>, vector<96x1024xf32>,
    %c64 = arith.constant 64 : index
    %c0_6 = arith.constant 0 : index
    %8 = vector.load %arg1[%c64, %c0_6] : memref<193x1024xbf16, #tpu.memory_space<vmem>>, vector<128x512xbf16>
    %c0_7 = arith.constant 0 : index
    %c0_8 = arith.constant 0 : index
    %9 = vector.load %arg4[%c0_7, %c0_8] : memref<96x1024xf32, #tpu.memory_space<vmem>>, vector<8x512xf32>
    %cst_9 = arith.constant 0.000000e+00 : f32
    %10 = vector.broadcast %cst_9 : f32 to vector<8x128xf32>
    %11 = vector.extract_strided_slice %9 {offsets = [0, 0], sizes = [8, 128], strides = [1, 1]} : vector<8x512xf32> to vector<8x128xf32>
    %12 = arith.negf %11 : vector<8x128xf32>
    %13 = math.exp %12 : vector<8x128xf32>
    %cst_10 = arith.constant 1.000000e+00 : f32
    %14 = vector.broadcast %cst_10 : f32 to vector<8x128xf32>
    %15 = arith.addf %14, %13 : vector<8x128xf32>
    %16 = arith.divf %14, %15 : vector<8x128xf32>
    %17 = vector.extract_strided_slice %9 {offsets = [0, 128], sizes = [8, 128], strides = [1, 1]} : vector<8x512xf32> to vector<8x128xf32>
    %18 = arith.negf %17 : vector<8x128xf32>
    %19 = math.exp %18 : vector<8x128xf32>
    %cst_11 = arith.constant 1.000000e+00 : f32
    %20 = vector.broadcast %cst_11 : f32 to vector<8x128xf32>
    %21 = arith.addf %20, %19 : vector<8x128xf32>
    %22 = arith.divf %20, %21 : vector<8x128xf32>
    %23 = vector.extract_strided_slice %9 {offsets = [0, 256], sizes = [8, 128], strides = [1, 1]} : vector<8x512xf32> to vector<8x128xf32>
    %24 = math.tanh %23 : vector<8x128xf32>
    %25 = vector.extract_strided_slice %9 {offsets = [0, 384], sizes = [8, 128], strides = [1, 1]} : vector<8x512xf32> to vector<8x128xf32>
    %26 = arith.negf %25 : vector<8x128xf32>
    %27 = math.exp %26 : vector<8x128xf32>
    %cst_12 = arith.constant 1.000000e+00 : f32
    %28 = vector.broadcast %cst_12 : f32 to vector<8x128xf32>
    %29 = arith.addf %28, %27 : vector<8x128xf32>
    %30 = arith.divf %28, %29 : vector<8x128xf32>
    %31 = arith.mulf %22, %10 : vector<8x128xf32>
    %32 = arith.mulf %16, %24 : vector<8x128xf32>
    %33 = arith.addf %31, %32 : vector<8x128xf32>
    %34 = math.tanh %33 : vector<8x128xf32>
    %35 = arith.mulf %30, %34 : vector<8x128xf32>
    %c8 = arith.constant 8 : index
    %c0_13 = arith.constant 0 : index
    %36 = vector.load %arg4[%c8, %c0_13] : memref<96x1024xf32, #tpu.memory_space<vmem>>, vector<8x512xf32>
    %37 = arith.truncf %35 : vector<8x128xf32> to vector<8x128xbf16>
    %cst_14 = arith.constant dense<0.000000e+00> : vector<8x512xf32>
    %38 = tpu.matmul %37, %8, %cst_14 {dimension_numbers = #tpu.dot_dimension_numbers<[1], [0], [0], [1], [0, 0, 1, 1], [], []>} : vector<8x128xbf16>, vector<128x512xbf16>, vector<8x512xf32> -> vector<8x512xf32>
    %39 = arith.addf %36, %38 : vector<8x512xf32>
    %40 = vector.extract_strided_slice %39 {offsets = [0, 0], sizes = [8, 128], strides = [1, 1]} : vector<8x512xf32> to vector<8x128xf32>
    %41 = arith.negf %40 : vector<8x128xf32>
    %42 = math.exp %41 : vector<8x128xf32>
    %cst_15 = arith.constant 1.000000e+00 : f32
    %43 = vector.broadcast %cst_15 : f32 to vector<8x128xf32>
    %44 = arith.addf %43, %42 : vector<8x128xf32>
    %45 = arith.divf %43, %44 : vector<8x128xf32>
    %46 = vector.extract_strided_slice %39 {offsets = [0, 128], sizes = [8, 128], strides = [1, 1]} : vector<8x512xf32> to vector<8x128xf32>
    %47 = arith.negf %46 : vector<8x128xf32>
    %48 = math.exp %47 : vector<8x128xf32>
    %cst_16 = arith.constant 1.000000e+00 : f32
    %49 = vector.broadcast %cst_16 : f32 to vector<8x128xf32>
    %50 = arith.addf %49, %48 : vector<8x128xf32>
    %51 = arith.divf %49, %50 : vector<8x128xf32>
    %52 = vector.extract_strided_slice %39 {offsets = [0, 256], sizes = [8, 128], strides = [1, 1]} : vector<8x512xf32> to vector<8x128xf32>
    %53 = math.tanh %52 : vector<8x128xf32>
    %54 = vector.extract_strided_slice %39 {offsets = [0, 384], sizes = [8, 128], strides = [1, 1]} : vector<8x512xf32> to vector<8x128xf32>
    %55 = arith.negf %54 : vector<8x128xf32>
    %56 = math.exp %55 : vector<8x128xf32>
    %cst_17 = arith.constant 1.000000e+00 : f32
    %57 = vector.broadcast %cst_17 : f32 to vector<8x128xf32>
    %58 = arith.addf %57, %56 : vector<8x128xf32>
    %59 = arith.divf %57, %58 : vector<8x128xf32>
    %60 = arith.mulf %51, %33 : vector<8x128xf32>
    %61 = arith.mulf %45, %53 : vector<8x128xf32>
    %62 = arith.addf %60, %61 : vector<8x128xf32>
    %63 = math.tanh %62 : vector<8x128xf32>
    %64 = arith.mulf %59, %63 : vector<8x128xf32>
    %c16 = arith.constant 16 : index
    %c0_18 = arith.constant 0 : index
    %65 = vector.load %arg4[%c16, %c0_18] : memref<96x1024xf32, #tpu.memory_space<vmem>>, vector<8x512xf32>
    %66 = arith.truncf %64 : vector<8x128xf32> to vector<8x128xbf16>
    %cst_19 = arith.constant dense<0.000000e+00> : vector<8x512xf32>
    %67 = tpu.matmul %66, %8, %cst_19 {dimension_numbers = #tpu.dot_dimension_numbers<[1], [0], [0], [1], [0, 0, 1, 1], [], []>} : vector<8x128xbf16>, vector<128x512xbf16>, vector<8x512xf32> -> vector<8x512xf32>
    %68 = arith.addf %65, %67 : vector<8x512xf32>
    %69 = vector.extract_strided_slice %68 {offsets = [0, 0], sizes = [8, 128], strides = [1, 1]} : vector<8x512xf32> to vector<8x128xf32>
    %70 = arith.negf %69 : vector<8x128xf32>
    %71 = math.exp %70 : vector<8x128xf32>
    %cst_20 = arith.constant 1.000000e+00 : f32
    %72 = vector.broadcast %cst_20 : f32 to vector<8x128xf32>
    %73 = arith.addf %72, %71 : vector<8x128xf32>
    %74 = arith.divf %72, %73 : vector<8x128xf32>
    %75 = vector.extract_strided_slice %68 {offsets = [0, 128], sizes = [8, 128], strides = [1, 1]} : vector<8x512xf32> to vector<8x128xf32>
    %76 = arith.negf %75 : vector<8x128xf32>
    %77 = math.exp %76 : vector<8x128xf32>
    %cst_21 = arith.constant 1.000000e+00 : f32
    %78 = vector.broadcast %cst_21 : f32 to vector<8x128xf32>
    %79 = arith.addf %78, %77 : vector<8x128xf32>
    %80 = arith.divf %78, %79 : vector<8x128xf32>
    %81 = vector.extract_strided_slice %68 {offsets = [0, 256], sizes = [8, 128], strides = [1, 1]} : vector<8x512xf32> to vector<8x128xf32>
    %82 = math.tanh %81 : vector<8x128xf32>
    %83 = vector.extract_strided_slice %68 {offsets = [0, 384], sizes = [8, 128], strides = [1, 1]} : vector<8x512xf32> to vector<8x128xf32>
    %84 = arith.negf %83 : vector<8x128xf32>
    %85 = math.exp %84 : vector<8x128xf32>
    %cst_22 = arith.constant 1.000000e+00 : f32
    %86 = vector.broadcast %cst_22 : f32 to vector<8x128xf32>
    %87 = arith.addf %86, %85 : vector<8x128xf32>
    %88 = arith.divf %86, %87 : vector<8x128xf32>
    %89 = arith.mulf %80, %62 : vector<8x128xf32>
    %90 = arith.mulf %74, %82 : vector<8x128xf32>
    %91 = arith.addf %89, %90 : vector<8x128xf32>
    %92 = math.tanh %91 : vector<8x128xf32>
    %93 = arith.mulf %88, %92 : vector<8x128xf32>
    %c24 = arith.constant 24 : index
    %c0_23 = arith.constant 0 : index
    %94 = vector.load %arg4[%c24, %c0_23] : memref<96x1024xf32, #tpu.memory_space<vmem>>, vector<8x512xf32>
    %95 = arith.truncf %93 : vector<8x128xf32> to vector<8x128xbf16>
    %cst_24 = arith.constant dense<0.000000e+00> : vector<8x512xf32>
    %96 = tpu.matmul %95, %8, %cst_24 {dimension_numbers = #tpu.dot_dimension_numbers<[1], [0], [0], [1], [0, 0, 1, 1], [], []>} : vector<8x128xbf16>, vector<128x512xbf16>, vector<8x512xf32> -> vector<8x512xf32>
    %97 = arith.addf %94, %96 : vector<8x512xf32>
    %98 = vector.extract_strided_slice %97 {offsets = [0, 0], sizes = [8, 128], strides = [1, 1]} : vector<8x512xf32> to vector<8x128xf32>
    %99 = arith.negf %98 : vector<8x128xf32>
    %100 = math.exp %99 : vector<8x128xf32>
    %cst_25 = arith.constant 1.000000e+00 : f32
    %101 = vector.broadcast %cst_25 : f32 to vector<8x128xf32>
    %102 = arith.addf %101, %100 : vector<8x128xf32>
    %103 = arith.divf %101, %102 : vector<8x128xf32>
    %104 = vector.extract_strided_slice %97 {offsets = [0, 128], sizes = [8, 128], strides = [1, 1]} : vector<8x512xf32> to vector<8x128xf32>
    %105 = arith.negf %104 : vector<8x128xf32>
    %106 = math.exp %105 : vector<8x128xf32>
    %cst_26 = arith.constant 1.000000e+00 : f32
    %107 = vector.broadcast %cst_26 : f32 to vector<8x128xf32>
    %108 = arith.addf %107, %106 : vector<8x128xf32>
    %109 = arith.divf %107, %108 : vector<8x128xf32>
    %110 = vector.extract_strided_slice %97 {offsets = [0, 256], sizes = [8, 128], strides = [1, 1]} : vector<8x512xf32> to vector<8x128xf32>
    %111 = math.tanh %110 : vector<8x128xf32>
    %112 = vector.extract_strided_slice %97 {offsets = [0, 384], sizes = [8, 128], strides = [1, 1]} : vector<8x512xf32> to vector<8x128xf32>
    %113 = arith.negf %112 : vector<8x128xf32>
    %114 = math.exp %113 : vector<8x128xf32>
    %cst_27 = arith.constant 1.000000e+00 : f32
    %115 = vector.broadcast %cst_27 : f32 to vector<8x128xf32>
    %116 = arith.addf %115, %114 : vector<8x128xf32>
    %117 = arith.divf %115, %116 : vector<8x128xf32>
    %118 = arith.mulf %109, %91 : vector<8x128xf32>
    %119 = arith.mulf %103, %111 : vector<8x128xf32>
    %120 = arith.addf %118, %119 : vector<8x128xf32>
    %121 = math.tanh %120 : vector<8x128xf32>
    %122 = arith.mulf %117, %121 : vector<8x128xf32>
    %c32 = arith.constant 32 : index
    %c0_28 = arith.constant 0 : index
    %123 = vector.load %arg4[%c32, %c0_28] : memref<96x1024xf32, #tpu.memory_space<vmem>>, vector<8x512xf32>
    %124 = arith.truncf %122 : vector<8x128xf32> to vector<8x128xbf16>
    %cst_29 = arith.constant dense<0.000000e+00> : vector<8x512xf32>
    %125 = tpu.matmul %124, %8, %cst_29 {dimension_numbers = #tpu.dot_dimension_numbers<[1], [0], [0], [1], [0, 0, 1, 1], [], []>} : vector<8x128xbf16>, vector<128x512xbf16>, vector<8x512xf32> -> vector<8x512xf32>
    %126 = arith.addf %123, %125 : vector<8x512xf32>
    %127 = vector.extract_strided_slice %126 {offsets = [0, 0], sizes = [8, 128], strides = [1, 1]} : vector<8x512xf32> to vector<8x128xf32>
    %128 = arith.negf %127 : vector<8x128xf32>
    %129 = math.exp %128 : vector<8x128xf32>
    %cst_30 = arith.constant 1.000000e+00 : f32
    %130 = vector.broadcast %cst_30 : f32 to vector<8x128xf32>
    %131 = arith.addf %130, %129 : vector<8x128xf32>
    %132 = arith.divf %130, %131 : vector<8x128xf32>
    %133 = vector.extract_strided_slice %126 {offsets = [0, 128], sizes = [8, 128], strides = [1, 1]} : vector<8x512xf32> to vector<8x128xf32>
    %134 = arith.negf %133 : vector<8x128xf32>
    %135 = math.exp %134 : vector<8x128xf32>
    %cst_31 = arith.constant 1.000000e+00 : f32
    %136 = vector.broadcast %cst_31 : f32 to vector<8x128xf32>
    %137 = arith.addf %136, %135 : vector<8x128xf32>
    %138 = arith.divf %136, %137 : vector<8x128xf32>
    %139 = vector.extract_strided_slice %126 {offsets = [0, 256], sizes = [8, 128], strides = [1, 1]} : vector<8x512xf32> to vector<8x128xf32>
    %140 = math.tanh %139 : vector<8x128xf32>
    %141 = vector.extract_strided_slice %126 {offsets = [0, 384], sizes = [8, 128], strides = [1, 1]} : vector<8x512xf32> to vector<8x128xf32>
    %142 = arith.negf %141 : vector<8x128xf32>
    %143 = math.exp %142 : vector<8x128xf32>
    %cst_32 = arith.constant 1.000000e+00 : f32
    %144 = vector.broadcast %cst_32 : f32 to vector<8x128xf32>
    %145 = arith.addf %144, %143 : vector<8x128xf32>
    %146 = arith.divf %144, %145 : vector<8x128xf32>
    %147 = arith.mulf %138, %120 : vector<8x128xf32>
    %148 = arith.mulf %132, %140 : vector<8x128xf32>
    %149 = arith.addf %147, %148 : vector<8x128xf32>
    %150 = math.tanh %149 : vector<8x128xf32>
    %151 = arith.mulf %146, %150 : vector<8x128xf32>
    %c40 = arith.constant 40 : index
    %c0_33 = arith.constant 0 : index
    %152 = vector.load %arg4[%c40, %c0_33] : memref<96x1024xf32, #tpu.memory_space<vmem>>, vector<8x512xf32>
    %153 = arith.truncf %151 : vector<8x128xf32> to vector<8x128xbf16>
    %cst_34 = arith.constant dense<0.000000e+00> : vector<8x512xf32>
    %154 = tpu.matmul %153, %8, %cst_34 {dimension_numbers = #tpu.dot_dimension_numbers<[1], [0], [0], [1], [0, 0, 1, 1], [], []>} : vector<8x128xbf16>, vector<128x512xbf16>, vector<8x512xf32> -> vector<8x512xf32>
    %155 = arith.addf %152, %154 : vector<8x512xf32>
    %156 = vector.extract_strided_slice %155 {offsets = [0, 0], sizes = [8, 128], strides = [1, 1]} : vector<8x512xf32> to vector<8x128xf32>
    %157 = arith.negf %156 : vector<8x128xf32>
    %158 = math.exp %157 : vector<8x128xf32>
    %cst_35 = arith.constant 1.000000e+00 : f32
    %159 = vector.broadcast %cst_35 : f32 to vector<8x128xf32>
    %160 = arith.addf %159, %158 : vector<8x128xf32>
    %161 = arith.divf %159, %160 : vector<8x128xf32>
    %162 = vector.extract_strided_slice %155 {offsets = [0, 128], sizes = [8, 128], strides = [1, 1]} : vector<8x512xf32> to vector<8x128xf32>
    %163 = arith.negf %162 : vector<8x128xf32>
    %164 = math.exp %163 : vector<8x128xf32>
    %cst_36 = arith.constant 1.000000e+00 : f32
    %165 = vector.broadcast %cst_36 : f32 to vector<8x128xf32>
    %166 = arith.addf %165, %164 : vector<8x128xf32>
    %167 = arith.divf %165, %166 : vector<8x128xf32>
    %168 = vector.extract_strided_slice %155 {offsets = [0, 256], sizes = [8, 128], strides = [1, 1]} : vector<8x512xf32> to vector<8x128xf32>
    %169 = math.tanh %168 : vector<8x128xf32>
    %170 = vector.extract_strided_slice %155 {offsets = [0, 384], sizes = [8, 128], strides = [1, 1]} : vector<8x512xf32> to vector<8x128xf32>
    %171 = arith.negf %170 : vector<8x128xf32>
    %172 = math.exp %171 : vector<8x128xf32>
    %cst_37 = arith.constant 1.000000e+00 : f32
    %173 = vector.broadcast %cst_37 : f32 to vector<8x128xf32>
    %174 = arith.addf %173, %172 : vector<8x128xf32>
    %175 = arith.divf %173, %174 : vector<8x128xf32>
    %176 = arith.mulf %167, %149 : vector<8x128xf32>
    %177 = arith.mulf %161, %169 : vector<8x128xf32>
    %178 = arith.addf %176, %177 : vector<8x128xf32>
    %179 = math.tanh %178 : vector<8x128xf32>
    %180 = arith.mulf %175, %179 : vector<8x128xf32>
    %c48 = arith.constant 48 : index
    %c0_38 = arith.constant 0 : index
    %181 = vector.load %arg4[%c48, %c0_38] : memref<96x1024xf32, #tpu.memory_space<vmem>>, vector<8x512xf32>
    %182 = arith.truncf %180 : vector<8x128xf32> to vector<8x128xbf16>
    %cst_39 = arith.constant dense<0.000000e+00> : vector<8x512xf32>
    %183 = tpu.matmul %182, %8, %cst_39 {dimension_numbers = #tpu.dot_dimension_numbers<[1], [0], [0], [1], [0, 0, 1, 1], [], []>} : vector<8x128xbf16>, vector<128x512xbf16>, vector<8x512xf32> -> vector<8x512xf32>
    %184 = arith.addf %181, %183 : vector<8x512xf32>
    %185 = vector.extract_strided_slice %184 {offsets = [0, 0], sizes = [8, 128], strides = [1, 1]} : vector<8x512xf32> to vector<8x128xf32>
    %186 = arith.negf %185 : vector<8x128xf32>
    %187 = math.exp %186 : vector<8x128xf32>
    %cst_40 = arith.constant 1.000000e+00 : f32
    %188 = vector.broadcast %cst_40 : f32 to vector<8x128xf32>
    %189 = arith.addf %188, %187 : vector<8x128xf32>
    %190 = arith.divf %188, %189 : vector<8x128xf32>
    %191 = vector.extract_strided_slice %184 {offsets = [0, 128], sizes = [8, 128], strides = [1, 1]} : vector<8x512xf32> to vector<8x128xf32>
    %192 = arith.negf %191 : vector<8x128xf32>
    %193 = math.exp %192 : vector<8x128xf32>
    %cst_41 = arith.constant 1.000000e+00 : f32
    %194 = vector.broadcast %cst_41 : f32 to vector<8x128xf32>
    %195 = arith.addf %194, %193 : vector<8x128xf32>
    %196 = arith.divf %194, %195 : vector<8x128xf32>
    %197 = vector.extract_strided_slice %184 {offsets = [0, 256], sizes = [8, 128], strides = [1, 1]} : vector<8x512xf32> to vector<8x128xf32>
    %198 = math.tanh %197 : vector<8x128xf32>
    %199 = vector.extract_strided_slice %184 {offsets = [0, 384], sizes = [8, 128], strides = [1, 1]} : vector<8x512xf32> to vector<8x128xf32>
    %200 = arith.negf %199 : vector<8x128xf32>
    %201 = math.exp %200 : vector<8x128xf32>
    %cst_42 = arith.constant 1.000000e+00 : f32
    %202 = vector.broadcast %cst_42 : f32 to vector<8x128xf32>
    %203 = arith.addf %202, %201 : vector<8x128xf32>
    %204 = arith.divf %202, %203 : vector<8x128xf32>
    %205 = arith.mulf %196, %178 : vector<8x128xf32>
    %206 = arith.mulf %190, %198 : vector<8x128xf32>
    %207 = arith.addf %205, %206 : vector<8x128xf32>
    %208 = math.tanh %207 : vector<8x128xf32>
    %209 = arith.mulf %204, %208 : vector<8x128xf32>
    %c56 = arith.constant 56 : index
    %c0_43 = arith.constant 0 : index
    %210 = vector.load %arg4[%c56, %c0_43] : memref<96x1024xf32, #tpu.memory_space<vmem>>, vector<8x512xf32>
    %211 = arith.truncf %209 : vector<8x128xf32> to vector<8x128xbf16>
    %cst_44 = arith.constant dense<0.000000e+00> : vector<8x512xf32>
    %212 = tpu.matmul %211, %8, %cst_44 {dimension_numbers = #tpu.dot_dimension_numbers<[1], [0], [0], [1], [0, 0, 1, 1], [], []>} : vector<8x128xbf16>, vector<128x512xbf16>, vector<8x512xf32> -> vector<8x512xf32>
    %213 = arith.addf %210, %212 : vector<8x512xf32>
    %214 = vector.extract_strided_slice %213 {offsets = [0, 0], sizes = [8, 128], strides = [1, 1]} : vector<8x512xf32> to vector<8x128xf32>
    %215 = arith.negf %214 : vector<8x128xf32>
    %216 = math.exp %215 : vector<8x128xf32>
    %cst_45 = arith.constant 1.000000e+00 : f32
    %217 = vector.broadcast %cst_45 : f32 to vector<8x128xf32>
    %218 = arith.addf %217, %216 : vector<8x128xf32>
    %219 = arith.divf %217, %218 : vector<8x128xf32>
    %220 = vector.extract_strided_slice %213 {offsets = [0, 128], sizes = [8, 128], strides = [1, 1]} : vector<8x512xf32> to vector<8x128xf32>
    %221 = arith.negf %220 : vector<8x128xf32>
    %222 = math.exp %221 : vector<8x128xf32>
    %cst_46 = arith.constant 1.000000e+00 : f32
    %223 = vector.broadcast %cst_46 : f32 to vector<8x128xf32>
    %224 = arith.addf %223, %222 : vector<8x128xf32>
    %225 = arith.divf %223, %224 : vector<8x128xf32>
    %226 = vector.extract_strided_slice %213 {offsets = [0, 256], sizes = [8, 128], strides = [1, 1]} : vector<8x512xf32> to vector<8x128xf32>
    %227 = math.tanh %226 : vector<8x128xf32>
    %228 = vector.extract_strided_slice %213 {offsets = [0, 384], sizes = [8, 128], strides = [1, 1]} : vector<8x512xf32> to vector<8x128xf32>
    %229 = arith.negf %228 : vector<8x128xf32>
    %230 = math.exp %229 : vector<8x128xf32>
    %cst_47 = arith.constant 1.000000e+00 : f32
    %231 = vector.broadcast %cst_47 : f32 to vector<8x128xf32>
    %232 = arith.addf %231, %230 : vector<8x128xf32>
    %233 = arith.divf %231, %232 : vector<8x128xf32>
    %234 = arith.mulf %225, %207 : vector<8x128xf32>
    %235 = arith.mulf %219, %227 : vector<8x128xf32>
    %236 = arith.addf %234, %235 : vector<8x128xf32>
    %237 = math.tanh %236 : vector<8x128xf32>
    %238 = arith.mulf %233, %237 : vector<8x128xf32>
    %c64_48 = arith.constant 64 : index
    %c0_49 = arith.constant 0 : index
    %239 = vector.load %arg4[%c64_48, %c0_49] : memref<96x1024xf32, #tpu.memory_space<vmem>>, vector<8x512xf32>
    %240 = arith.truncf %238 : vector<8x128xf32> to vector<8x128xbf16>
    %cst_50 = arith.constant dense<0.000000e+00> : vector<8x512xf32>
    %241 = tpu.matmul %240, %8, %cst_50 {dimension_numbers = #tpu.dot_dimension_numbers<[1], [0], [0], [1], [0, 0, 1, 1], [], []>} : vector<8x128xbf16>, vector<128x512xbf16>, vector<8x512xf32> -> vector<8x512xf32>
    %242 = arith.addf %239, %241 : vector<8x512xf32>
    %243 = vector.extract_strided_slice %242 {offsets = [0, 0], sizes = [8, 128], strides = [1, 1]} : vector<8x512xf32> to vector<8x128xf32>
    %244 = arith.negf %243 : vector<8x128xf32>
    %245 = math.exp %244 : vector<8x128xf32>
    %cst_51 = arith.constant 1.000000e+00 : f32
    %246 = vector.broadcast %cst_51 : f32 to vector<8x128xf32>
    %247 = arith.addf %246, %245 : vector<8x128xf32>
    %248 = arith.divf %246, %247 : vector<8x128xf32>
    %249 = vector.extract_strided_slice %242 {offsets = [0, 128], sizes = [8, 128], strides = [1, 1]} : vector<8x512xf32> to vector<8x128xf32>
    %250 = arith.negf %249 : vector<8x128xf32>
    %251 = math.exp %250 : vector<8x128xf32>
    %cst_52 = arith.constant 1.000000e+00 : f32
    %252 = vector.broadcast %cst_52 : f32 to vector<8x128xf32>
    %253 = arith.addf %252, %251 : vector<8x128xf32>
    %254 = arith.divf %252, %253 : vector<8x128xf32>
    %255 = vector.extract_strided_slice %242 {offsets = [0, 256], sizes = [8, 128], strides = [1, 1]} : vector<8x512xf32> to vector<8x128xf32>
    %256 = math.tanh %255 : vector<8x128xf32>
    %257 = vector.extract_strided_slice %242 {offsets = [0, 384], sizes = [8, 128], strides = [1, 1]} : vector<8x512xf32> to vector<8x128xf32>
    %258 = arith.negf %257 : vector<8x128xf32>
    %259 = math.exp %258 : vector<8x128xf32>
    %cst_53 = arith.constant 1.000000e+00 : f32
    %260 = vector.broadcast %cst_53 : f32 to vector<8x128xf32>
    %261 = arith.addf %260, %259 : vector<8x128xf32>
    %262 = arith.divf %260, %261 : vector<8x128xf32>
    %263 = arith.mulf %254, %236 : vector<8x128xf32>
    %264 = arith.mulf %248, %256 : vector<8x128xf32>
    %265 = arith.addf %263, %264 : vector<8x128xf32>
    %266 = math.tanh %265 : vector<8x128xf32>
    %267 = arith.mulf %262, %266 : vector<8x128xf32>
    %c72 = arith.constant 72 : index
    %c0_54 = arith.constant 0 : index
    %268 = vector.load %arg4[%c72, %c0_54] : memref<96x1024xf32, #tpu.memory_space<vmem>>, vector<8x512xf32>
    %269 = arith.truncf %267 : vector<8x128xf32> to vector<8x128xbf16>
    %cst_55 = arith.constant dense<0.000000e+00> : vector<8x512xf32>
    %270 = tpu.matmul %269, %8, %cst_55 {dimension_numbers = #tpu.dot_dimension_numbers<[1], [0], [0], [1], [0, 0, 1, 1], [], []>} : vector<8x128xbf16>, vector<128x512xbf16>, vector<8x512xf32> -> vector<8x512xf32>
    %271 = arith.addf %268, %270 : vector<8x512xf32>
    %272 = vector.extract_strided_slice %271 {offsets = [0, 0], sizes = [8, 128], strides = [1, 1]} : vector<8x512xf32> to vector<8x128xf32>
    %273 = arith.negf %272 : vector<8x128xf32>
    %274 = math.exp %273 : vector<8x128xf32>
    %cst_56 = arith.constant 1.000000e+00 : f32
    %275 = vector.broadcast %cst_56 : f32 to vector<8x128xf32>
    %276 = arith.addf %275, %274 : vector<8x128xf32>
    %277 = arith.divf %275, %276 : vector<8x128xf32>
    %278 = vector.extract_strided_slice %271 {offsets = [0, 128], sizes = [8, 128], strides = [1, 1]} : vector<8x512xf32> to vector<8x128xf32>
    %279 = arith.negf %278 : vector<8x128xf32>
    %280 = math.exp %279 : vector<8x128xf32>
    %cst_57 = arith.constant 1.000000e+00 : f32
    %281 = vector.broadcast %cst_57 : f32 to vector<8x128xf32>
    %282 = arith.addf %281, %280 : vector<8x128xf32>
    %283 = arith.divf %281, %282 : vector<8x128xf32>
    %284 = vector.extract_strided_slice %271 {offsets = [0, 256], sizes = [8, 128], strides = [1, 1]} : vector<8x512xf32> to vector<8x128xf32>
    %285 = math.tanh %284 : vector<8x128xf32>
    %286 = vector.extract_strided_slice %271 {offsets = [0, 384], sizes = [8, 128], strides = [1, 1]} : vector<8x512xf32> to vector<8x128xf32>
    %287 = arith.negf %286 : vector<8x128xf32>
    %288 = math.exp %287 : vector<8x128xf32>
    %cst_58 = arith.constant 1.000000e+00 : f32
    %289 = vector.broadcast %cst_58 : f32 to vector<8x128xf32>
    %290 = arith.addf %289, %288 : vector<8x128xf32>
    %291 = arith.divf %289, %290 : vector<8x128xf32>
    %292 = arith.mulf %283, %265 : vector<8x128xf32>
    %293 = arith.mulf %277, %285 : vector<8x128xf32>
    %294 = arith.addf %292, %293 : vector<8x128xf32>
    %295 = math.tanh %294 : vector<8x128xf32>
    %296 = arith.mulf %291, %295 : vector<8x128xf32>
    %c80 = arith.constant 80 : index
    %c0_59 = arith.constant 0 : index
    %297 = vector.load %arg4[%c80, %c0_59] : memref<96x1024xf32, #tpu.memory_space<vmem>>, vector<8x512xf32>
    %298 = arith.truncf %296 : vector<8x128xf32> to vector<8x128xbf16>
    %cst_60 = arith.constant dense<0.000000e+00> : vector<8x512xf32>
    %299 = tpu.matmul %298, %8, %cst_60 {dimension_numbers = #tpu.dot_dimension_numbers<[1], [0], [0], [1], [0, 0, 1, 1], [], []>} : vector<8x128xbf16>, vector<128x512xbf16>, vector<8x512xf32> -> vector<8x512xf32>
    %300 = arith.addf %297, %299 : vector<8x512xf32>
    %301 = vector.extract_strided_slice %300 {offsets = [0, 0], sizes = [8, 128], strides = [1, 1]} : vector<8x512xf32> to vector<8x128xf32>
    %302 = arith.negf %301 : vector<8x128xf32>
    %303 = math.exp %302 : vector<8x128xf32>
    %cst_61 = arith.constant 1.000000e+00 : f32
    %304 = vector.broadcast %cst_61 : f32 to vector<8x128xf32>
    %305 = arith.addf %304, %303 : vector<8x128xf32>
    %306 = arith.divf %304, %305 : vector<8x128xf32>
    %307 = vector.extract_strided_slice %300 {offsets = [0, 128], sizes = [8, 128], strides = [1, 1]} : vector<8x512xf32> to vector<8x128xf32>
    %308 = arith.negf %307 : vector<8x128xf32>
    %309 = math.exp %308 : vector<8x128xf32>
    %cst_62 = arith.constant 1.000000e+00 : f32
    %310 = vector.broadcast %cst_62 : f32 to vector<8x128xf32>
    %311 = arith.addf %310, %309 : vector<8x128xf32>
    %312 = arith.divf %310, %311 : vector<8x128xf32>
    %313 = vector.extract_strided_slice %300 {offsets = [0, 256], sizes = [8, 128], strides = [1, 1]} : vector<8x512xf32> to vector<8x128xf32>
    %314 = math.tanh %313 : vector<8x128xf32>
    %315 = vector.extract_strided_slice %300 {offsets = [0, 384], sizes = [8, 128], strides = [1, 1]} : vector<8x512xf32> to vector<8x128xf32>
    %316 = arith.negf %315 : vector<8x128xf32>
    %317 = math.exp %316 : vector<8x128xf32>
    %cst_63 = arith.constant 1.000000e+00 : f32
    %318 = vector.broadcast %cst_63 : f32 to vector<8x128xf32>
    %319 = arith.addf %318, %317 : vector<8x128xf32>
    %320 = arith.divf %318, %319 : vector<8x128xf32>
    %321 = arith.mulf %312, %294 : vector<8x128xf32>
    %322 = arith.mulf %306, %314 : vector<8x128xf32>
    %323 = arith.addf %321, %322 : vector<8x128xf32>
    %324 = math.tanh %323 : vector<8x128xf32>
    %325 = arith.mulf %320, %324 : vector<8x128xf32>
    %c88 = arith.constant 88 : index
    %c0_64 = arith.constant 0 : index
    %326 = vector.load %arg4[%c88, %c0_64] : memref<96x1024xf32, #tpu.memory_space<vmem>>, vector<8x512xf32>
    %327 = arith.truncf %325 : vector<8x128xf32> to vector<8x128xbf16>
    %cst_65 = arith.constant dense<0.000000e+00> : vector<8x512xf32>
    %328 = tpu.matmul %327, %8, %cst_65 {dimension_numbers = #tpu.dot_dimension_numbers<[1], [0], [0], [1], [0, 0, 1, 1], [], []>} : vector<8x128xbf16>, vector<128x512xbf16>, vector<8x512xf32> -> vector<8x512xf32>
    %329 = arith.addf %326, %328 : vector<8x512xf32>
    %330 = vector.extract_strided_slice %329 {offsets = [0, 0], sizes = [8, 128], strides = [1, 1]} : vector<8x512xf32> to vector<8x128xf32>
    %331 = arith.negf %330 : vector<8x128xf32>
    %332 = math.exp %331 : vector<8x128xf32>
    %cst_66 = arith.constant 1.000000e+00 : f32
    %333 = vector.broadcast %cst_66 : f32 to vector<8x128xf32>
    %334 = arith.addf %333, %332 : vector<8x128xf32>
    %335 = arith.divf %333, %334 : vector<8x128xf32>
    %336 = vector.extract_strided_slice %329 {offsets = [0, 128], sizes = [8, 128], strides = [1, 1]} : vector<8x512xf32> to vector<8x128xf32>
    %337 = arith.negf %336 : vector<8x128xf32>
    %338 = math.exp %337 : vector<8x128xf32>
    %cst_67 = arith.constant 1.000000e+00 : f32
    %339 = vector.broadcast %cst_67 : f32 to vector<8x128xf32>
    %340 = arith.addf %339, %338 : vector<8x128xf32>
    %341 = arith.divf %339, %340 : vector<8x128xf32>
    %342 = vector.extract_strided_slice %329 {offsets = [0, 256], sizes = [8, 128], strides = [1, 1]} : vector<8x512xf32> to vector<8x128xf32>
    %343 = math.tanh %342 : vector<8x128xf32>
    %344 = vector.extract_strided_slice %329 {offsets = [0, 384], sizes = [8, 128], strides = [1, 1]} : vector<8x512xf32> to vector<8x128xf32>
    %345 = arith.negf %344 : vector<8x128xf32>
    %346 = math.exp %345 : vector<8x128xf32>
    %cst_68 = arith.constant 1.000000e+00 : f32
    %347 = vector.broadcast %cst_68 : f32 to vector<8x128xf32>
    %348 = arith.addf %347, %346 : vector<8x128xf32>
    %349 = arith.divf %347, %348 : vector<8x128xf32>
    %350 = arith.mulf %341, %323 : vector<8x128xf32>
    %351 = arith.mulf %335, %343 : vector<8x128xf32>
    %352 = arith.addf %350, %351 : vector<8x128xf32>
    %353 = math.tanh %352 : vector<8x128xf32>
    %354 = arith.mulf %349, %353 : vector<8x128xf32>
    %c88_69 = arith.constant 88 : index
    %c512 = arith.constant 512 : index
    %355 = vector.load %arg4[%c88_69, %c512] : memref<96x1024xf32, #tpu.memory_space<vmem>>, vector<8x512xf32>
    %cst_70 = arith.constant 0.000000e+00 : f32
    %356 = vector.broadcast %cst_70 : f32 to vector<8x128xf32>
    %357 = vector.extract_strided_slice %355 {offsets = [0, 0], sizes = [8, 128], strides = [1, 1]} : vector<8x512xf32> to vector<8x128xf32>
    %358 = arith.negf %357 : vector<8x128xf32>
    %359 = math.exp %358 : vector<8x128xf32>
    %cst_71 = arith.constant 1.000000e+00 : f32
    %360 = vector.broadcast %cst_71 : f32 to vector<8x128xf32>
    %361 = arith.addf %360, %359 : vector<8x128xf32>
    %362 = arith.divf %360, %361 : vector<8x128xf32>
    %363 = vector.extract_strided_slice %355 {offsets = [0, 128], sizes = [8, 128], strides = [1, 1]} : vector<8x512xf32> to vector<8x128xf32>
    %364 = arith.negf %363 : vector<8x128xf32>
    %365 = math.exp %364 : vector<8x128xf32>
    %cst_72 = arith.constant 1.000000e+00 : f32
    %366 = vector.broadcast %cst_72 : f32 to vector<8x128xf32>
    %367 = arith.addf %366, %365 : vector<8x128xf32>
    %368 = arith.divf %366, %367 : vector<8x128xf32>
    %369 = vector.extract_strided_slice %355 {offsets = [0, 256], sizes = [8, 128], strides = [1, 1]} : vector<8x512xf32> to vector<8x128xf32>
    %370 = math.tanh %369 : vector<8x128xf32>
    %371 = vector.extract_strided_slice %355 {offsets = [0, 384], sizes = [8, 128], strides = [1, 1]} : vector<8x512xf32> to vector<8x128xf32>
    %372 = arith.negf %371 : vector<8x128xf32>
    %373 = math.exp %372 : vector<8x128xf32>
    %cst_73 = arith.constant 1.000000e+00 : f32
    %374 = vector.broadcast %cst_73 : f32 to vector<8x128xf32>
    %375 = arith.addf %374, %373 : vector<8x128xf32>
    %376 = arith.divf %374, %375 : vector<8x128xf32>
    %377 = arith.mulf %368, %356 : vector<8x128xf32>
    %378 = arith.mulf %362, %370 : vector<8x128xf32>
    %379 = arith.addf %377, %378 : vector<8x128xf32>
    %380 = math.tanh %379 : vector<8x128xf32>
    %381 = arith.mulf %376, %380 : vector<8x128xf32>
    %382 = tpu.concatenate %354, %381 in 1 : vector<8x128xf32>, vector<8x128xf32> -> vector<8x256xf32>
    %c0_74 = arith.constant 0 : index
    %c0_75 = arith.constant 0 : index
    %383 = vector.load %arg2[%c0_74, %c0_75] : memref<515x128xbf16, #tpu.memory_space<vmem>>, vector<256x128xbf16>
    %c256 = arith.constant 256 : index
    %c0_76 = arith.constant 0 : index
    %384 = vector.load %arg2[%c256, %c0_76] : memref<515x128xbf16, #tpu.memory_space<vmem>>, vector<128x128xbf16>
    %c384 = arith.constant 384 : index
    %c0_77 = arith.constant 0 : index
    %385 = vector.load %arg2[%c384, %c0_77] : memref<515x128xbf16, #tpu.memory_space<vmem>>, vector<128x128xbf16>
    %c512_78 = arith.constant 512 : index
    %c0_79 = arith.constant 0 : index
    %386 = vector.load %arg2[%c512_78, %c0_79] : memref<515x128xbf16, #tpu.memory_space<vmem>>, vector<3x128xbf16>
    %387 = arith.extf %386 : vector<3x128xbf16> to vector<3x128xf32>
    %388 = arith.truncf %382 : vector<8x256xf32> to vector<8x256xbf16>
    %cst_80 = arith.constant dense<0.000000e+00> : vector<8x128xf32>
    %389 = tpu.matmul %388, %383, %cst_80 {dimension_numbers = #tpu.dot_dimension_numbers<[1], [0], [0], [1], [0, 0, 1, 1], [], []>} : vector<8x256xbf16>, vector<256x128xbf16>, vector<8x128xf32> -> vector<8x128xf32>
    %390 = vector.extract_strided_slice %387 {offsets = [0, 0], sizes = [1, 128], strides = [1, 1]} : vector<3x128xf32> to vector<1x128xf32>
    %391 = vector.broadcast %390 : vector<1x128xf32> to vector<8x128xf32>
    %392 = arith.addf %389, %391 : vector<8x128xf32>
    %cst_81 = arith.constant 0.000000e+00 : f32
    %393 = vector.broadcast %cst_81 : f32 to vector<8x128xf32>
    %394 = arith.maximumf %392, %393 : vector<8x128xf32>
    %395 = arith.truncf %394 : vector<8x128xf32> to vector<8x128xbf16>
    %cst_82 = arith.constant dense<0.000000e+00> : vector<8x128xf32>
    %396 = tpu.matmul %395, %384, %cst_82 {dimension_numbers = #tpu.dot_dimension_numbers<[1], [0], [0], [1], [0, 0, 1, 1], [], []>} : vector<8x128xbf16>, vector<128x128xbf16>, vector<8x128xf32> -> vector<8x128xf32>
    %397 = vector.extract_strided_slice %387 {offsets = [1, 0], sizes = [1, 128], strides = [1, 1]} : vector<3x128xf32> to vector<1x128xf32>
    %398 = vector.broadcast %397 : vector<1x128xf32> to vector<8x128xf32>
    %399 = arith.addf %396, %398 : vector<8x128xf32>
    %cst_83 = arith.constant 0.000000e+00 : f32
    %400 = vector.broadcast %cst_83 : f32 to vector<8x128xf32>
    %401 = arith.maximumf %399, %400 : vector<8x128xf32>
    %402 = arith.truncf %401 : vector<8x128xf32> to vector<8x128xbf16>
    %cst_84 = arith.constant dense<0.000000e+00> : vector<8x128xf32>
    %403 = tpu.matmul %402, %385, %cst_84 {dimension_numbers = #tpu.dot_dimension_numbers<[1], [0], [0], [1], [0, 0, 1, 1], [], []>} : vector<8x128xbf16>, vector<128x128xbf16>, vector<8x128xf32> -> vector<8x128xf32>
    %404 = vector.extract_strided_slice %387 {offsets = [2, 0], sizes = [1, 128], strides = [1, 1]} : vector<3x128xf32> to vector<1x128xf32>
    %405 = vector.broadcast %404 : vector<1x128xf32> to vector<8x128xf32>
    %406 = arith.addf %403, %405 : vector<8x128xf32>
    %c0_85 = arith.constant 0 : index
    %c0_86 = arith.constant 0 : index
    %407 = vector.load %arg3[%c0_85, %c0_86] : memref<8x128xf32, #tpu.memory_space<vmem>>, vector<8x128xf32>
    tpu.vector_store %arg3[%c0_85, %c0_86], %406 {strides = array<i32>} : memref<8x128xf32, #tpu.memory_space<vmem>>, vector<8x128xf32>,
    return
  }
}

</mosaic_0001>

<bundles_post_ra>
// kernel: tpu_custom_call.1
= control target key start
LH: loop header
LB: loop body
LE: loop exit
PB: predicated region body
PF: predicated region fallthrough
CT: control target
= control target key end

     0   :  { %8 = vsyncpa [#allocation4], 0  ;;  %s4160_s0 = inlined_call_operand.vmem [shape: bf16[96,64], index: 0, kind: input, shape index: {}]   ;;  %s4161_s1 = inlined_call_operand.hbm [shape: bf16[193,1024], index: 1, kind: input, shape index: {}]   ;;  %s4162_s2 = inlined_call_operand.hbm [shape: bf16[515,128], index: 2, kind: input, shape index: {}]   ;;  %s4163_s3 = inlined_call_operand.hbm [shape: f32[8,128], index: 3, kind: output, shape index: {}]  }
   0x1   :  { %9 = vsyncpa [#allocation7], 0 }
   0x2   :  { %10 = vsyncpa [#allocation5], 0  ;;  %s3312_s12 = smov [#allocation3]  }
   0x3   :  { %s18_s13 = sshll.u32 %s3312_s12, 4  ;;  %s19_s13 = int_to_ptr.vmem [resolvable:$true] %s18_s13 }
   0x4   :  { %s3254_s14 = scalar_lea.vmem %s19_s13, 12800  ;;  %p3259_p1 = scmp.lt.s32.totalorder %s19_s13, %s19_s13 }
   0x5   :  { %p3255_p0 = scmp.ne.s32.totalorder %s19_s13, %s3254_s14  ;;  %p3260_p2 = scmp.lt.s32.totalorder %s3254_s14, %s3254_s14 }
   0x7   :  { %p3261_p3 = por %p3260_p2, %p3259_p1 }
   0x9   :  { %p3262_p4 = pnand %p3261_p3, %p3255_p0 }
   0xb   :  { %3265 = shalt.err (!%p3262_p4)
}
   0xc   :  { %s3313_s15 = smov 512   ;;  %s3314_s16 = smov 32  }
   0xd   :  { %24 = dma.hbm_to_vmem [thread:$0]  %s4161_s1, 12800, %s19_s13, [#allocation4], %s3313_s15, %s3313_s15, %s3314_s16  }
   0xe   :  { %s3315_s19 = smov [#allocation6]  }
   0xf   :  { %s30_s20 = sshll.u32 %s3315_s19, 4  ;;  %s31_s20 = int_to_ptr.vmem [resolvable:$true] %s30_s20 }
  0x10   :  { %s3274_s21 = scalar_lea.vmem %s31_s20, 4160  ;;  %p3279_p6 = scmp.lt.s32.totalorder %s31_s20, %s31_s20 }
  0x11   :  { %p3275_p5 = scmp.ne.s32.totalorder %s31_s20, %s3274_s21  ;;  %p3280_p7 = scmp.lt.s32.totalorder %s3274_s21, %s3274_s21 }
  0x13   :  { %p3281_p8 = por %p3280_p7, %p3279_p6 }
  0x15   :  { %p3282_p9 = pnand %p3281_p8, %p3275_p5 }
  0x17   :  { %3285 = shalt.err (!%p3282_p9)
}
  0x18   :  { %s3316_s22 = smov 64   ;;  %s3317_s23 = smov 4  }
  0x19   :  { %36 = dma.hbm_to_vmem [thread:$0]  %s4162_s2, 4160, %s31_s20, [#allocation7], %s3316_s22, %s3316_s22, %s3317_s23  }
  0x1a   :  { %3306 = dma.done.wait [#allocation4], 12800  }
  0x1b   :  { %3307 = vsyncadd [#allocation4], 4294954496 }
  0x1c   :  { %3308 = dma.done.wait [#allocation7], 4160  }
  0x1d   :  { %3309 = vsyncadd [#allocation7], 4294963136  ;;  %v4164_v0 = vmov 0   ;;  %v68_v1 = vld [vmem:[#allocation3 + $0xc0] sm:$0xff]  ;;  %v69_v16 = vld [vmem:[#allocation3 + $0xc8] sm:$0xff]  ;;  %vm322_vm0 = vcmask 523264  }
  0x1e   :  { %373 = vmatprep.mubr.bf16.mxu0 %v4164_v0  ;;  %413 = vmatprep.mubr.bf16.mxu1 %v4164_v0  ;;  %v72_v2 = vld [vmem:[#allocation3 + $0xe0] sm:$0xff]  ;;  %v73_v17 = vld [vmem:[#allocation3 + $0xe8] sm:$0xff]  ;;  %v70_v18 = vld [vmem:[#allocation3 + $0xd0] sm:$0xff]  ;;  %vm3320_vm1 = vmmov 0  }
  0x1f   :  { %v60_v3 = vld [vmem:[#allocation3 + $0x80] sm:$0xff]  ;;  %v2766_v4 = vcombine.high %v68_v1, %v72_v2  ;;  %v2765_v5 = vcombine.low %v68_v1, %v72_v2  ;;  %v74_v19 = vld [vmem:[#allocation3 + $0xf0] sm:$0xff]  ;;  %v2768_v23 = vcombine.high %v69_v16, %v73_v17  ;;  %v61_v24 = vld [vmem:[#allocation3 + $0x88] sm:$0xff]  ;;  %v2767_v29 = vcombine.low %v69_v16, %v73_v17 }
  0x20   :  { %v64_v6 = vld [vmem:[#allocation3 + $0xa0] sm:$0xff]  ;;  %v2770_v25 = vcombine.high %v70_v18, %v74_v19  ;;  %v65_v26 = vld [vmem:[#allocation3 + $0xa8] sm:$0xff]  ;;  %v62_v27 = vld [vmem:[#allocation3 + $0x90] sm:$0xff]  ;;  %v2769_v33 = vcombine.low %v70_v18, %v74_v19 }
  0x21   :  { %v2758_v7 = vcombine.high %v60_v3, %v64_v6  ;;  %v52_v8 = vld [vmem:[#allocation3 + $0x40] sm:$0xff]  ;;  %349 = vmatprep.subr.bf16.mxu0 %v2766_v4  ;;  %2980 = vmatprep.subr.bf16.mxu1 %v2766_v4  ;;  %v2757_v10 = vcombine.low %v60_v3, %v64_v6  ;;  %v66_v28 = vld [vmem:[#allocation3 + $0xb0] sm:$0xff]  ;;  %v53_v30 = vld [vmem:[#allocation3 + $0x48] sm:$0xff]  ;;  %v2760_v32 = vcombine.high %v61_v24, %v65_v26 }
  0x22   :  { %v56_v9 = vld [vmem:[#allocation3 + $0x60] sm:$0xff]  ;;  %350 = vmatpush1.bf16.msra.mxu0 %v2765_v5  ;;  %2984 = vmatpush1.bf16.msra.mxu1 %v2765_v5  ;;  %v57_v31 = vld [vmem:[#allocation3 + $0x68] sm:$0xff]  ;;  %v54_v34 = vld [vmem:[#allocation3 + $0x50] sm:$0xff]  ;;  %v2762_v36 = vcombine.high %v62_v27, %v66_v28  ;;  %v2759_v37 = vcombine.low %v61_v24, %v65_v26  ;;  %v2761_v42 = vcombine.low %v62_v27, %v66_v28 }
  0x23   :  { %351 = vmatprep.subr.bf16.mxu0 %v2758_v7  ;;  %2981 = vmatprep.subr.bf16.mxu1 %v2758_v7  ;;  %v2750_v11 = vcombine.high %v52_v8, %v56_v9  ;;  %v44_v12 = vld [vmem:[#allocation3] sm:$0xff]  ;;  %v2749_v14 = vcombine.low %v52_v8, %v56_v9  ;;  %v58_v35 = vld [vmem:[#allocation3 + $0x70] sm:$0xff]  ;;  %v45_v38 = vld [vmem:[#allocation3 + $0x8] sm:$0xff]  ;;  %v2752_v41 = vcombine.high %v53_v30, %v57_v31 }
  0x24   :  { %v48_v13 = vld [vmem:[#allocation3 + $0x20] sm:$0xff]  ;;  %v49_v39 = vld [vmem:[#allocation3 + $0x28] sm:$0xff]  ;;  %v2754_v43 = vcombine.high %v54_v34, %v58_v35  ;;  %v2751_v45 = vcombine.low %v53_v30, %v57_v31  ;;  %v71_v46 = vld [vmem:[#allocation3 + $0xd8] sm:$0xff]  ;;  %v2753_v49 = vcombine.low %v54_v34, %v58_v35 }
  0x25   :  { %v2742_v15 = vcombine.high %v44_v12, %v48_v13  ;;  %v2741_v20 = vcombine.low %v44_v12, %v48_v13  ;;  %v3353_v21 = vld [vmem:[%s4160_s0] sm:$0xff]   ;;  %v3368_v40 = vld [vmem:[%s4160_s0 + $0x28] sm:$0xff]   ;;  %v75_v47 = vld [vmem:[#allocation3 + $0xf8] sm:$0xff]  ;;  %v2744_v48 = vcombine.high %v45_v38, %v49_v39  ;;  %v2743_v50 = vcombine.low %v45_v38, %v49_v39 }
  0x26   :  { %352 = vmatpush1.bf16.msra.mxu0 %v2757_v10  ;;  %2985 = vmatpush1.bf16.msra.mxu1 %v2757_v10  ;;  %v3358_v22 = vld [vmem:[%s4160_s0 + $0x20] sm:$0xff]   ;;  %v3374_v44 = vld [vmem:[%s4160_s0 + $0x8] sm:$0xff]   ;;  %v63_v51 = vld [vmem:[#allocation3 + $0x98] sm:$0xff]  ;;  %v2772_v53 = vcombine.high %v71_v46, %v75_v47  ;;  %v2771_v55 = vcombine.low %v71_v46, %v75_v47 }
  0x27   :  { %353 = vmatprep.subr.bf16.mxu0 %v2750_v11  ;;  %2982 = vmatprep.subr.bf16.mxu1 %v2750_v11  ;;  %v67_v52 = vld [vmem:[#allocation3 + $0xb8] sm:$0xff]  ;;  %v3002_v54 = vld [vmem:[%s4160_s0 + $0x10] sm:$0xff]   ;;  %v837_v8 = vld [vmem:[#allocation3 + $0x2c0] sm:$0xff] }
  0x28   :  { %v2764_v56 = vcombine.high %v63_v51, %v67_v52  ;;  %v2763_v57 = vcombine.low %v63_v51, %v67_v52  ;;  %v3393_v58 = vld [vmem:[%s4160_s0 + $0x18] sm:$0xff]   ;;  %v46_v59 = vld [vmem:[#allocation3 + $0x10] sm:$0xff]  ;;  %v839_v9 = vld [vmem:[#allocation3 + $0x2e0] sm:$0xff]  ;;  %s3321_s0 = smov [#allocation8]  }
  0x29   :  { %v50_v60 = vld [vmem:[#allocation3 + $0x30] sm:$0xff]  ;;  %v55_v63 = vld [vmem:[#allocation3 + $0x58] sm:$0xff]  ;;  %v3426_v10 = vcombine.high %v837_v8, %v839_v9  ;;  %v838_v11 = vld [vmem:[#allocation3 + $0x2c8] sm:$0xff]  ;;  %v3428_v13 = vcombine.low %v837_v8, %v839_v9  ;;  %s2725_s9 = sshll.u32 %s3321_s0, 4  ;;  %s2726_s9 = int_to_ptr.vmem [resolvable:$true] %s2725_s9 }
  0x2a   :  { %354 = vmatpush1.bf16.msra.mxu0 %v2749_v14  ;;  %2986 = vmatpush1.bf16.msra.mxu1 %v2749_v14  ;;  %v2746_v61 = vcombine.high %v46_v59, %v50_v60  ;;  %v2745_v62 = vcombine.low %v46_v59, %v50_v60  ;;  %v59_v1 = vld [vmem:[#allocation3 + $0x78] sm:$0xff]  ;;  %v840_v12 = vld [vmem:[#allocation3 + $0x2e8] sm:$0xff]  ;;  %v833_v16 = vld [vmem:[#allocation3 + $0x280] sm:$0xff]  ;;  %s3286_s10 = scalar_lea.vmem %s2726_s9, 128  ;;  %p3291_p11 = scmp.lt.s32.totalorder %s2726_s9, %s2726_s9 }
  0x2b   :  { %355 = vmatprep.subr.bf16.mxu0 %v2742_v15  ;;  %2983 = vmatprep.subr.bf16.mxu1 %v2742_v15  ;;  %v2756_v2 = vcombine.high %v55_v63, %v59_v1  ;;  %v2755_v3 = vcombine.low %v55_v63, %v59_v1  ;;  %v47_v4 = vld [vmem:[#allocation3 + $0x18] sm:$0xff]  ;;  %v3430_v14 = vcombine.high %v838_v11, %v840_v12  ;;  %v835_v17 = vld [vmem:[#allocation3 + $0x2a0] sm:$0xff]  ;;  %v834_v19 = vld [vmem:[#allocation3 + $0x288] sm:$0xff]  ;;  %p3287_p10 = scmp.ne.s32.totalorder %s2726_s9, %s3286_s10  ;;  %p3292_p12 = scmp.lt.s32.totalorder %s3286_s10, %s3286_s10 }
  0x2c   :  { %v51_v5 = vld [vmem:[#allocation3 + $0x38] sm:$0xff]  ;;  %v3434_v15 = vcombine.low %v838_v11, %v840_v12  ;;  %v3438_v18 = vcombine.high %v833_v16, %v835_v17  ;;  %v831_v26 = vld [vmem:[#allocation3 + $0x260] sm:$0xff]  ;;  %v830_v27 = vld [vmem:[#allocation3 + $0x248] sm:$0xff] }
  0x2d   :  { %v2748_v6 = vcombine.high %v47_v4, %v51_v5  ;;  %v2747_v7 = vcombine.low %v47_v4, %v51_v5  ;;  %v827_v34 = vld [vmem:[#allocation3 + $0x220] sm:$0xff]  ;;  %v826_v35 = vld [vmem:[#allocation3 + $0x208] sm:$0xff]  ;;  %p3293_p13 = por %p3292_p12, %p3291_p11 }
  0x2e   :  { %356 = vmatpush1.bf16.msra.mxu0 %v2741_v20  ;;  %2987 = vmatpush1.bf16.msra.mxu1 %v2741_v20  ;;  %v836_v20 = vld [vmem:[#allocation3 + $0x2a8] sm:$0xff]  ;;  %v819_v47 = vld [vmem:[#allocation3 + $0x1a0] sm:$0xff] }
  0x2f   :  { %442 = vmatprep.subr.bf16.mxu1 %v2768_v23  ;;  %535 = vmatprep.subr.bf16.mxu0 %v2770_v25  ;;  %v3445_v23 = vcombine.high %v834_v19, %v836_v20  ;;  %v3450_v24 = vcombine.low %v834_v19, %v836_v20  ;;  %v829_v25 = vld [vmem:[#allocation3 + $0x240] sm:$0xff]  ;;  %p3294_p0 = pnand %p3293_p13, %p3287_p10 }
  0x30   :  { %v3455_v28 = vcombine.high %v829_v25, %v831_v26  ;;  %v3457_v30 = vcombine.low %v829_v25, %v831_v26  ;;  %v809_v63 = vld [vmem:[#allocation3 + $0x100] sm:$0xff] }
  0x31   :  { %2773 = vmatmul.mubr.msk.bf16.vlgmr.msra.gmra.mxu0 %vm322_vm0, %v3353_v21  ;;  %2777 = vmatmul.mubr.msk.bf16.vlgmr.msra.gmra.mxu1 %vm322_vm0, %v3358_v22  ;;  %v811_v1 = vld [vmem:[#allocation3 + $0x120] sm:$0xff] }
  0x32   :  { %443 = vmatpush1.bf16.msra.mxu1 %v2767_v29  ;;  %423 = vmatprep.mubr.bf16.mxu1 %v4164_v0  ;;  %v832_v29 = vld [vmem:[#allocation3 + $0x268] sm:$0xff]  ;;  %v3522_v5 = vcombine.high %v809_v63, %v811_v1  ;;  %v3533_v8 = vcombine.low %v809_v63, %v811_v1  ;;  %v76_v12 = vld [vmem:[#allocation3 + $0x300] sm:$0x11] }
  0x33   :  { %444 = vmatprep.subr.bf16.mxu1 %v2760_v32  ;;  %536 = vmatpush1.bf16.msra.mxu0 %v2769_v33  ;;  %v3461_v31 = vcombine.high %v830_v27, %v832_v29  ;;  %v3463_v32 = vcombine.low %v830_v27, %v832_v29  ;;  %v825_v33 = vld [vmem:[#allocation3 + $0x200] sm:$0xff]  ;;  %v81_v19 = vunpack.c.h.bf16 %v76_v12 }
  0x34   :  { %383 = vmatprep.mubr.bf16.mxu0 %v4164_v0  ;;  %537 = vmatprep.subr.bf16.mxu0 %v2762_v36  ;;  %v3469_v36 = vcombine.high %v825_v33, %v827_v34  ;;  %v3474_v38 = vcombine.low %v825_v33, %v827_v34 }
  0x36   :  { %445 = vmatpush1.bf16.msra.mxu1 %v2759_v37  ;;  %v828_v37 = vld [vmem:[#allocation3 + $0x228] sm:$0xff] }
  0x37   :  { %446 = vmatprep.subr.bf16.mxu1 %v2752_v41  ;;  %538 = vmatpush1.bf16.msra.mxu0 %v2761_v42  ;;  %v3476_v39 = vcombine.high %v826_v35, %v828_v37  ;;  %v3478_v41 = vcombine.low %v826_v35, %v828_v37  ;;  %v821_v42 = vld [vmem:[#allocation3 + $0x1c0] sm:$0xff] }
  0x38   :  { %539 = vmatprep.subr.bf16.mxu0 %v2754_v43  ;;  %v823_v43 = vld [vmem:[#allocation3 + $0x1e0] sm:$0xff] }
  0x39   :  { %2778 = vmatmul.mubr.msk.bf16.gmra.mxu1 %vm322_vm0, %v3368_v40  ;;  %2774 = vmatmul.mubr.msk.bf16.gmra.mxu0 %vm322_vm0, %v3374_v44  ;;  %v3486_v46 = vcombine.low %v821_v42, %v823_v43 }
  0x3a   :  { %447 = vmatpush1.bf16.msra.mxu1 %v2751_v45  ;;  %466 = vmatprep.mubr.bf16.mxu1 %v4164_v0  ;;  %v3484_v45 = vcombine.high %v821_v42, %v823_v43 }
  0x3b   :  { %448 = vmatprep.subr.bf16.mxu1 %v2744_v48  ;;  %393 = vmatprep.mubr.bf16.mxu0 %v4164_v0  ;;  %v822_v48 = vld [vmem:[#allocation3 + $0x1c8] sm:$0xff] }
  0x3c   :  { %540 = vmatpush1.bf16.msra.mxu0 %v2753_v49  ;;  %v824_v49 = vld [vmem:[#allocation3 + $0x1e8] sm:$0xff] }
  0x3d   :  { %541 = vmatprep.subr.bf16.mxu0 %v2746_v61  ;;  %v3493_v51 = vcombine.high %v822_v48, %v824_v49  ;;  %v3495_v52 = vcombine.low %v822_v48, %v824_v49 }
  0x3e   :  { %449 = vmatpush1.bf16.msra.mxu1 %v2743_v50 }
  0x3f   :  { %628 = vmatprep.subr.bf16.mxu1 %v2772_v53  ;;  %v813_v53 = vld [vmem:[#allocation3 + $0x140] sm:$0xff] }
  0x40   :  { %542 = vmatpush1.bf16.msra.mxu0 %v2745_v62 }
  0x41   :  { %2779 = vmatmul.mubr.msk.bf16.vlgmr.msra.gmra.mxu1 %vm322_vm0, %v3353_v21  ;;  %2775 = vmatmul.mubr.msk.bf16.gmra.mxu0 %vm322_vm0, %v3002_v54 }
  0x42   :  { %476 = vmatprep.mubr.bf16.mxu1 %v4164_v0  ;;  %629 = vmatpush1.bf16.msra.mxu1 %v2771_v55  ;;  %v818_v55 = vld [vmem:[#allocation3 + $0x188] sm:$0xff] }
  0x43   :  { %630 = vmatprep.subr.bf16.mxu1 %v2764_v56  ;;  %403 = vmatprep.mubr.bf16.mxu0 %v4164_v0  ;;  %v820_v56 = vld [vmem:[#allocation3 + $0x1a8] sm:$0xff] }
  0x44   :  { %1034 = vmatprep.subr.bf16.mxu0 %v3426_v10  ;;  %v3509_v61 = vcombine.low %v818_v55, %v820_v56 }
  0x46   :  { %631 = vmatpush1.bf16.msra.mxu1 %v2763_v57  ;;  %v814_v57 = vld [vmem:[#allocation3 + $0x148] sm:$0xff] }
  0x47   :  { %632 = vmatprep.subr.bf16.mxu1 %v2756_v2  ;;  %v810_v2 = vld [vmem:[#allocation3 + $0x108] sm:$0xff] }
  0x49   :  { %2780 = vmatmul.mubr.msk.bf16.gmra.mxu1 %vm322_vm0, %v3374_v44  ;;  %2776 = vmatmul.mubr.msk.bf16.gmra.mxu0 %vm322_vm0, %v3393_v58 }
  0x4a   :  { %486 = vmatprep.mubr.bf16.mxu1 %v4164_v0  ;;  %559 = vmatprep.mubr.bf16.mxu0 %v4164_v0 }
  0x4b   :  { %633 = vmatpush1.bf16.msra.mxu1 %v2755_v3  ;;  %v812_v3 = vld [vmem:[#allocation3 + $0x128] sm:$0xff] }
  0x4c   :  { %634 = vmatprep.subr.bf16.mxu1 %v2748_v6  ;;  %v3537_v9 = vcombine.low %v810_v2, %v812_v3 }
  0x4f   :  { %635 = vmatpush1.bf16.msra.mxu1 %v2747_v7  ;;  %v3529_v7 = vcombine.high %v810_v2, %v812_v3 }
  0x50   :  { %1075 = vmatprep.subr.bf16.mxu1 %v3430_v14 }
  0x51   :  { %2781 = vmatmul.mubr.msk.bf16.gmra.mxu1 %vm322_vm0, %v3002_v54  ;;  %2785 = vmatmul.mubr.msk.bf16.vlgmr.msra.gmra.mxu0 %vm322_vm0, %v3353_v21 }
  0x52   :  { %496 = vmatprep.mubr.bf16.mxu1 %v4164_v0  ;;  %569 = vmatprep.mubr.bf16.mxu0 %v4164_v0 }
  0x53   :  { %1035 = vmatpush1.bf16.msra.mxu0 %v3428_v13 }
  0x54   :  { %1036 = vmatprep.subr.bf16.mxu0 %v3438_v18 }
  0x59   :  { %2782 = vmatmul.mubr.msk.bf16.gmra.mxu1 %vm322_vm0, %v3393_v58  ;;  %2786 = vmatmul.mubr.msk.bf16.gmra.mxu0 %vm322_vm0, %v3374_v44 }
  0x5a   :  { %506 = vmatprep.mubr.bf16.mxu1 %v4164_v0  ;;  %579 = vmatprep.mubr.bf16.mxu0 %v4164_v0 }
  0x61   :  { %2783 = vmatmul.mubr.msk.bf16.gmra.mxu1 %vm322_vm0, %v3358_v22  ;;  %2787 = vmatmul.mubr.msk.bf16.gmra.mxu0 %vm322_vm0, %v3002_v54 }
  0x62   :  { %516 = vmatprep.mubr.bf16.mxu1 %v4164_v0  ;;  %589 = vmatprep.mubr.bf16.mxu0 %v4164_v0 }
  0x69   :  { %2784 = vmatmul.mubr.msk.bf16.gmra.mxu1 %vm322_vm0, %v3368_v40  ;;  %2788 = vmatmul.mubr.msk.bf16.gmra.mxu0 %vm322_vm0, %v3393_v58 }
  0x6a   :  { %652 = vmatprep.mubr.bf16.mxu1 %v4164_v0  ;;  %599 = vmatprep.mubr.bf16.mxu0 %v4164_v0 }
  0x71   :  { %2791 = vmatmul.mubr.msk.bf16.vlgmr.msra.gmra.mxu1 %vm322_vm0, %v3353_v21  ;;  %v3443_v21 = vcombine.low %v833_v16, %v835_v17  ;;  %2789 = vmatmul.mubr.msk.bf16.gmra.mxu0 %vm322_vm0, %v3358_v22  ;;  %v80_v16 = vunpack.c.l.bf16 %v76_v12 }
  0x72   :  { %662 = vmatprep.mubr.bf16.mxu1 %v4164_v0  ;;  %1076 = vmatpush1.bf16.msra.mxu1 %v3434_v15 }
  0x73   :  { %1037 = vmatpush1.bf16.msra.mxu0 %v3443_v21  ;;  %1077 = vmatprep.subr.bf16.mxu1 %v3445_v23 }
  0x74   :  { %1038 = vmatprep.subr.bf16.mxu0 %v3455_v28  ;;  %609 = vmatprep.mubr.bf16.mxu0 %v4164_v0 }
  0x76   :  { %1078 = vmatpush1.bf16.msra.mxu1 %v3450_v24 }
  0x77   :  { %1039 = vmatpush1.bf16.msra.mxu0 %v3457_v30  ;;  %1079 = vmatprep.subr.bf16.mxu1 %v3461_v31 }
  0x78   :  { %1040 = vmatprep.subr.bf16.mxu0 %v3469_v36 }
  0x79   :  { %2792 = vmatmul.mubr.msk.bf16.gmra.mxu1 %vm322_vm0, %v3374_v44  ;;  %v817_v44 = vld [vmem:[#allocation3 + $0x180] sm:$0xff]  ;;  %2790 = vmatmul.mubr.msk.bf16.gmra.mxu0 %vm322_vm0, %v3368_v40 }
  0x7a   :  { %672 = vmatprep.mubr.bf16.mxu1 %v4164_v0  ;;  %1080 = vmatpush1.bf16.msra.mxu1 %v3463_v32  ;;  %v3489_v50 = vcombine.high %v817_v44, %v819_v47  ;;  %v3500_v59 = vcombine.low %v817_v44, %v819_v47 }
  0x7b   :  { %1041 = vmatpush1.bf16.msra.mxu0 %v3474_v38  ;;  %1081 = vmatprep.subr.bf16.mxu1 %v3476_v39 }
  0x7c   :  { %1042 = vmatprep.subr.bf16.mxu0 %v3484_v45  ;;  %1066 = vmatprep.mubr.bf16.mxu0 %v4164_v0 }
  0x7e   :  { %1082 = vmatpush1.bf16.msra.mxu1 %v3478_v41 }
  0x7f   :  { %1043 = vmatpush1.bf16.msra.mxu0 %v3486_v46  ;;  %1083 = vmatprep.subr.bf16.mxu1 %v3493_v51 }
  0x80   :  { %1044 = vmatprep.subr.bf16.mxu0 %v3489_v50 }
  0x81   :  { %2793 = vmatmul.mubr.msk.bf16.gmra.mxu1 %vm322_vm0, %v3002_v54  ;;  %v815_v54 = vld [vmem:[#allocation3 + $0x160] sm:$0xff] }
  0x82   :  { %682 = vmatprep.mubr.bf16.mxu1 %v4164_v0  ;;  %1084 = vmatpush1.bf16.msra.mxu1 %v3495_v52  ;;  %v3507_v60 = vcombine.high %v813_v53, %v815_v54  ;;  %v3518_v4 = vcombine.low %v813_v53, %v815_v54 }
  0x83   :  { %1045 = vmatpush1.bf16.msra.mxu0 %v3500_v59 }
  0x84   :  { %1046 = vmatprep.subr.bf16.mxu0 %v3507_v60 }
  0x87   :  { %1047 = vmatpush1.bf16.msra.mxu0 %v3518_v4 }
  0x88   :  { %1048 = vmatprep.subr.bf16.mxu0 %v3522_v5 }
  0x89   :  { %2794 = vmatmul.mubr.msk.bf16.gmra.mxu1 %vm322_vm0, %v3393_v58  ;;  %v816_v58 = vld [vmem:[#allocation3 + $0x168] sm:$0xff] }
  0x8a   :  { %692 = vmatprep.mubr.bf16.mxu1 %v4164_v0  ;;  %v3514_v62 = vcombine.high %v814_v57, %v816_v58  ;;  %v3524_v6 = vcombine.low %v814_v57, %v816_v58 }
  0x8b   :  { %1049 = vmatpush1.bf16.msra.mxu0 %v3533_v8 }
  0x8c   :  { %1149 = vmatprep.subr.bf16.mxu0 %v3426_v10 }
  0x91   :  { %2795 = vmatmul.mubr.msk.bf16.gmra.mxu1 %vm322_vm0, %v3358_v22  ;;  %v3503_v22 = vcombine.high %v818_v55, %v820_v56  ;;  %v77_v56 = vld [vmem:[#allocation3 + $0x308] sm:$0x11] }
  0x92   :  { %702 = vmatprep.mubr.bf16.mxu1 %v4164_v0  ;;  %v82_v3 = vunpack.c.l.bf16 %v77_v56 }
  0x93   :  { %1085 = vmatprep.subr.bf16.mxu1 %v3503_v22 }
  0x94   :  { %1086 = vmatpush1.bf16.msra.mxu1 %v3509_v61 }
  0x95   :  { %1087 = vmatprep.subr.bf16.mxu1 %v3514_v62 }
  0x98   :  { %1088 = vmatpush1.bf16.msra.mxu1 %v3524_v6 }
  0x99   :  { %2796 = vmatmul.mubr.msk.bf16.gmra.mxu1 %vm322_vm0, %v3368_v40  ;;  %1089 = vmatprep.subr.bf16.mxu1 %v3529_v7  ;;  %v100_v40 = vlaneseq }
  0x9a   :  { %1107 = vmatprep.mubr.bf16.mxu1 %v4164_v0 }
  0x9b   :  { %v3544_v11 = vshrl.u32 %v100_v40, 7 }
  0x9c   :  { %1090 = vmatpush1.bf16.msra.mxu1 %v3537_v9 }
  0x9d   :  { %1190 = vmatprep.subr.bf16.mxu1 %v3430_v14  ;;  %4168 = vst [vmem:[#allocation12_spill] sm:$0xff] %v3544_v11  ;;  %v3547_v17 = vsub.s32 0, %v3544_v11 }
  0x9f   :  { %v3550_v20 = vrot.slane %v80_v16, %v3547_v17  ;;  %v3553_v25 = vrot.slane %v81_v19, %v3547_v17 }
  0xf1   :  { %v375_v26 = vpop.f32.mrf.mxu0  ;;  %v415_v27 = vpop.f32.mrf.mxu1 }
  0xf2   :  { %v376_v29 = vadd.f32 %v375_v26, %v3550_v20  ;;  %v3557_v33 = vadd.f32 %v415_v27, %v3550_v20  ;;  %v83_v26 = vunpack.c.h.bf16 %v77_v56 }
  0xf3   :  { %v377_v34 = vpop.f32.mrf.mxu0  ;;  %v417_v35 = vpop.f32.mrf.mxu1 }
  0xf4   :  { %4169 = vst [vmem:[#allocation13_spill] sm:$0xff] %v3557_v33  ;;  %v2797_v37 = vmul.f32 -1.442695, %v376_v29  ;;  %v378_v42 = vadd.f32 %v377_v34, %v3553_v25  ;;  %v3561_v43 = vadd.f32 %v417_v35, %v3553_v25 }
  0xf5   :  { %v379_v44 = vpop.f32.mrf.mxu0  ;;  %v419_v47 = vpop.f32.mrf.mxu1 }
  0xf6   :  { %4170 = vst [vmem:[#allocation14_spill] sm:$0xff] %v3561_v43  ;;  %3036 = vpow2.f32 %v2797_v37  ;;  %v2798_v48 = vmul.f32 -1.442695, %v378_v42  ;;  %v3564_v49 = vadd.f32 %v379_v44, %v3550_v20  ;;  %v3567_v53 = vadd.f32 %v419_v47, %v3550_v20 }
  0xf7   :  { %v381_v54 = vpop.f32.mrf.mxu0  ;;  %v421_v55 = vpop.f32.mrf.mxu1  ;;  %v3591_v37 = vrot.slane %v82_v3, %v3547_v17 }
  0xf8   :  { %4171 = vst [vmem:[#allocation15_spill] sm:$0xff] %v3567_v53  ;;  %3038 = vpow2.f32 %v2798_v48  ;;  %v3570_v57 = vadd.f32 %v381_v54, %v3553_v25  ;;  %v3573_v58 = vadd.f32 %v421_v55, %v3553_v25  ;;  %v3600_v54 = vrot.slane %v83_v26, %v3547_v17 }
  0xf9   :  { %v425_v63 = vpop.f32.mrf.mxu1  ;;  %v385_v1 = vpop.f32.mrf.mxu0 }
  0xfa   :  { %4172 = vst [vmem:[#allocation16_spill] sm:$0xff] %v3573_v58  ;;  %v3576_v2 = vadd.f32 %v425_v63, %v3550_v20  ;;  %v3579_v40 = vadd.f32 %v385_v1, %v3550_v20 }
  0xfb   :  { %v427_v12 = vpop.f32.mrf.mxu1  ;;  %v387_v16 = vpop.f32.mrf.mxu0 }
  0xfc   :  { %4173 = vst [vmem:[#allocation17_spill] sm:$0xff] %v3576_v2  ;;  %v3582_v19 = vadd.f32 %v427_v12, %v3553_v25  ;;  %v3585_v27 = vadd.f32 %v387_v16, %v3553_v25 }
  0xfd   :  { %v429_v29 = vpop.f32.mrf.mxu1  ;;  %v389_v34 = vpop.f32.mrf.mxu0 }
  0xfe   :  { %4174 = vst [vmem:[#allocation18_spill] sm:$0xff] %v3582_v19  ;;  %v3588_v35 = vadd.f32 %v429_v29, %v3550_v20  ;;  %v3594_v42 = vadd.f32 %v389_v34, %v3550_v20 }
  0xff   :  { %v431_v44 = vpop.f32.mrf.mxu1  ;;  %v391_v47 = vpop.f32.mrf.mxu0 }
 0x100   :  { %4175 = vst [vmem:[#allocation19_spill] sm:$0xff] %v3588_v35  ;;  %v3597_v48 = vadd.f32 %v431_v44, %v3553_v25  ;;  %v3603_v55 = vadd.f32 %v391_v47, %v3553_v25 }
 0x101   :  { %v468_v56 = vpop.f32.mrf.mxu1  ;;  %v395_v63 = vpop.f32.mrf.mxu0 }
 0x102   :  { %4176 = vst [vmem:[#allocation20_spill] sm:$0xff] %v3597_v48  ;;  %4177 = vst [vmem:[#allocation21_spill] sm:$0xff] %v3603_v55  ;;  %v469_v1 = vadd.f32 %v468_v56, %v3591_v37  ;;  %v3607_v3 = vadd.f32 %v395_v63, %v3550_v20 }
 0x103   :  { %v3037_v12 = vpop.eup %3036  ;;  %v470_v16 = vpop.f32.mrf.mxu1 }
 0x104   :  { %4178 = vst [vmem:[#allocation22_spill] sm:$0xff] %v3607_v3  ;;  %v397_v29 = vpop.f32.mrf.mxu0  ;;  %v848_v34 = vadd.f32 1.0, %v3037_v12  ;;  %v471_v44 = vadd.f32 %v470_v16, %v3600_v54  ;;  %3040 = vtanh.f32 %v469_v1 }
 0x105   :  { %v3611_v0 = vadd.f32 %v397_v29, %v3553_v25  ;;  %v3039_v26 = vpop.eup %3038  ;;  %v472_v47 = vpop.f32.mrf.mxu1 }
 0x106   :  { %v399_v11 = vpop.f32.mrf.mxu0  ;;  %3042 = vrcp.f32 %v848_v34  ;;  %v854_v48 = vadd.f32 1.0, %v3039_v26  ;;  %v2799_v35 = vmul.f32 -1.442695, %v471_v44  ;;  %v3614_v56 = vadd.f32 %v472_v47, %v3591_v37 }
 0x107   :  { %4179 = vst [vmem:[#allocation23_spill] sm:$0xff] %v3611_v0  ;;  %v474_v63 = vpop.f32.mrf.mxu1  ;;  %v3617_v19 = vadd.f32 %v399_v11, %v3550_v20 }
 0x108   :  { %v401_v12 = vpop.f32.mrf.mxu0  ;;  %3044 = vrcp.f32 %v854_v48  ;;  %v3620_v16 = vadd.f32 %v474_v63, %v3600_v54 }
 0x109   :  { %4180 = vst [vmem:[#allocation24_spill] sm:$0xff] %v3617_v19  ;;  %v3623_v29 = vadd.f32 %v401_v12, %v3553_v25  ;;  %3046 = vpow2.f32 %v2799_v35  ;;  %v478_v1 = vpop.f32.mrf.mxu1 }
 0x10a   :  { %v405_v34 = vpop.f32.mrf.mxu0  ;;  %v3626_v44 = vadd.f32 %v478_v1, %v3591_v37 }
 0x10b   :  { %4181 = vst [vmem:[#allocation25_spill] sm:$0xff] %v3623_v29  ;;  %v3629_v26 = vadd.f32 %v405_v34, %v3550_v20  ;;  %v480_v47 = vpop.f32.mrf.mxu1 }
 0x10c   :  { %v407_v11 = vpop.f32.mrf.mxu0  ;;  %v3632_v2 = vadd.f32 %v480_v47, %v3600_v54 }
 0x10d   :  { %4182 = vst [vmem:[#allocation26_spill] sm:$0xff] %v3629_v26  ;;  %v3635_v48 = vadd.f32 %v407_v11, %v3553_v25  ;;  %v482_v63 = vpop.f32.mrf.mxu1 }
 0x10e   :  { %v409_v12 = vpop.f32.mrf.mxu0  ;;  %v3638_v35 = vadd.f32 %v482_v63, %v3591_v37 }
 0x10f   :  { %4183 = vst [vmem:[#allocation27_spill] sm:$0xff] %v3635_v48  ;;  %v3641_v58 = vadd.f32 %v409_v12, %v3550_v20  ;;  %v484_v1 = vpop.f32.mrf.mxu1 }
 0x110   :  { %4184 = vst [vmem:[#allocation28_spill] sm:$0xff] %v3638_v35  ;;  %v411_v53 = vpop.f32.mrf.mxu0  ;;  %v3644_v34 = vadd.f32 %v484_v1, %v3600_v54 }
 0x111   :  { %4185 = vst [vmem:[#allocation29_spill] sm:$0xff] %v3641_v58  ;;  %v3647_v43 = vadd.f32 %v411_v53, %v3553_v25  ;;  %v488_v47 = vpop.f32.mrf.mxu1  ;;  %v3041_v33 = vpop.eup %3040 }
 0x112   :  { %4186 = vst [vmem:[#allocation30_spill] sm:$0xff] %v3644_v34  ;;  %v3650_v11 = vadd.f32 %v488_v47, %v3591_v37 }
 0x113   :  { %4187 = vst [vmem:[#allocation31_spill] sm:$0xff] %v3647_v43  ;;  %v3043_v48 = vpop.eup %3042  ;;  %v490_v26 = vpop.f32.mrf.mxu1 }
 0x114   :  { %4188 = vst [vmem:[#allocation32_spill] sm:$0xff] %v3650_v11  ;;  %v3653_v63 = vadd.f32 %v490_v26, %v3600_v54  ;;  %v865_v19 = vmul.f32 %v3043_v48, %v3041_v33 }
 0x115   :  { %v3045_v20 = vpop.eup %3044  ;;  %v492_v12 = vpop.f32.mrf.mxu1 }
 0x116   :  { %4189 = vst [vmem:[#allocation33_spill] sm:$0xff] %v3653_v63  ;;  %v3047_v58 = vpop.eup %3046  ;;  %v864_v29 = vmul.f32 0.0, %v3045_v20  ;;  %v3656_v1 = vadd.f32 %v492_v12, %v3591_v37 }
 0x117   :  { %v861_v25 = vadd.f32 1.0, %v3047_v58  ;;  %v494_v53 = vpop.f32.mrf.mxu1 }
 0x118   :  { %4190 = vst [vmem:[#allocation34_spill] sm:$0xff] %v3656_v1  ;;  %v3658_v43 = vadd.f32 %v865_v19, %v864_v29  ;;  %v3661_v47 = vadd.f32 %v494_v53, %v3600_v54 }
 0x119   :  { %3048 = vrcp.f32 %v861_v25  ;;  %v498_v11 = vpop.f32.mrf.mxu1 }
 0x11a   :  { %4191 = vst [vmem:[#allocation35_spill] sm:$0xff] %v3661_v47  ;;  %3050 = vtanh.f32 %v3658_v43  ;;  %v3665_v26 = vadd.f32 %v498_v11, %v3591_v37 }
 0x11b   :  { %v500_v63 = vpop.f32.mrf.mxu1 }
 0x11c   :  { %4192 = vst [vmem:[#allocation36_spill] sm:$0xff] %v3665_v26  ;;  %v3668_v33 = vadd.f32 %v500_v63, %v3600_v54 }
 0x11d   :  { %v502_v48 = vpop.f32.mrf.mxu1 }
 0x11e   :  { %4193 = vst [vmem:[#allocation37_spill] sm:$0xff] %v3668_v33  ;;  %v3671_v58 = vadd.f32 %v502_v48, %v3591_v37 }
 0x11f   :  { %v504_v19 = vpop.f32.mrf.mxu1 }
 0x120   :  { %4194 = vst [vmem:[#allocation38_spill] sm:$0xff] %v3671_v58  ;;  %v3674_v29 = vadd.f32 %v504_v19, %v3600_v54 }
 0x121   :  { %v508_v20 = vpop.f32.mrf.mxu1 }
 0x122   :  { %4195 = vst [vmem:[#allocation39_spill] sm:$0xff] %v3674_v29  ;;  %v3677_v12 = vadd.f32 %v508_v20, %v3591_v37 }
 0x123   :  { %v510_v25 = vpop.f32.mrf.mxu1 }
 0x124   :  { %4196 = vst [vmem:[#allocation40_spill] sm:$0xff] %v3677_v12  ;;  %v3680_v11 = vadd.f32 %v510_v25, %v3600_v54 }
 0x125   :  { %v512_v53 = vpop.f32.mrf.mxu1 }
 0x126   :  { %4197 = vst [vmem:[#allocation41_spill] sm:$0xff] %v3680_v11  ;;  %v3049_v26 = vpop.eup %3048  ;;  %v3683_v63 = vadd.f32 %v512_v53, %v3591_v37 }
 0x127   :  { %v3051_v33 = vpop.eup %3050  ;;  %v514_v48 = vpop.f32.mrf.mxu1 }
 0x128   :  { %4198 = vst [vmem:[#allocation42_spill] sm:$0xff] %v3683_v63  ;;  %v868_v58 = vmul.f32 %v3051_v33, %v3049_v26  ;;  %v3686_v1 = vadd.f32 %v514_v48, %v3600_v54 }
 0x129   :  { %v518_v19 = vpop.f32.mrf.mxu1 }
 0x12a   :  { %4199 = vst [vmem:[#allocation43_spill] sm:$0xff] %v3686_v1  ;;  %v873_v29 = vpack.c.bf16 %v868_v58, %v868_v58  ;;  %v3689_v20 = vadd.f32 %v518_v19, %v3591_v37  ;;  %v4203_v58 = vmov 0  }
 0x12b   :  { %v520_v12 = vpop.f32.mrf.mxu1 }
 0x12c   :  { %4200 = vst [vmem:[#allocation44_spill] sm:$0xff] %v3689_v20  ;;  %1067 = vmatmul.mubr.bf16.vlgmr.msra.gmra.mxu0 %v873_v29  ;;  %1108 = vmatmul.mubr.bf16.vlgmr.msra.gmra.mxu1 %v873_v29  ;;  %v3692_v25 = vadd.f32 %v520_v12, %v3600_v54 }
 0x12d   :  { %v522_v11 = vpop.f32.mrf.mxu1  ;;  %1150 = vmatpush1.bf16.msra.mxu0 %v3428_v13  ;;  %1191 = vmatpush1.bf16.msra.mxu1 %v3434_v15 }
 0x12e   :  { %4201 = vst [vmem:[#allocation45_spill] sm:$0xff] %v3692_v25  ;;  %v3697_v26 = vadd.f32 %v522_v11, %v3591_v37  ;;  %1151 = vmatprep.subr.bf16.mxu0 %v3438_v18  ;;  %1192 = vmatprep.subr.bf16.mxu1 %v3445_v23  ;;  %v561_v37 = vpop.f32.mrf.mxu0 }
 0x12f   :  { %v524_v33 = vpop.f32.mrf.mxu1  ;;  %1181 = vmatprep.mubr.bf16.mxu0 %v4203_v58  ;;  %1222 = vmatprep.mubr.bf16.mxu1 %v4203_v58 }
 0x130   :  { %4202 = vst [vmem:[#allocation46_spill] sm:$0xff] %v3697_v26  ;;  %v3704_v29 = vadd.f32 %v524_v33, %v3600_v54  ;;  %v563_v12 = vpop.f32.mrf.mxu0 }
 0x131   :  { %1152 = vmatpush1.bf16.msra.mxu0 %v3443_v21  ;;  %1193 = vmatpush1.bf16.msra.mxu1 %v3450_v24  ;;  %v654_v53 = vpop.f32.mrf.mxu1 }
 0x132   :  { %4204 = vst [vmem:[#allocation47_spill] sm:$0xff] %v3704_v29  ;;  %1153 = vmatprep.subr.bf16.mxu0 %v3455_v28  ;;  %1194 = vmatprep.subr.bf16.mxu1 %v3461_v31  ;;  %v565_v54 = vpop.f32.mrf.mxu0 }
 0x133   :  { %v656_v19 = vpop.f32.mrf.mxu1 }
 0x134   :  { %v567_v11 = vpop.f32.mrf.mxu0 }
 0x135   :  { %1154 = vmatpush1.bf16.msra.mxu0 %v3457_v30  ;;  %1195 = vmatpush1.bf16.msra.mxu1 %v3463_v32  ;;  %v658_v37 = vpop.f32.mrf.mxu1 }
 0x136   :  { %1155 = vmatprep.subr.bf16.mxu0 %v3469_v36  ;;  %1196 = vmatprep.subr.bf16.mxu1 %v3476_v39  ;;  %v571_v48 = vpop.f32.mrf.mxu0 }
 0x137   :  { %v660_v54 = vpop.f32.mrf.mxu1 }
 0x138   :  { %v573_v33 = vpop.f32.mrf.mxu0 }
 0x139   :  { %1156 = vmatpush1.bf16.msra.mxu0 %v3474_v38  ;;  %1197 = vmatpush1.bf16.msra.mxu1 %v3478_v41  ;;  %v664_v53 = vpop.f32.mrf.mxu1 }
 0x13a   :  { %1157 = vmatprep.subr.bf16.mxu0 %v3484_v45  ;;  %1198 = vmatprep.subr.bf16.mxu1 %v3493_v51  ;;  %v575_v12 = vpop.f32.mrf.mxu0 }
 0x13b   :  { %v666_v19 = vpop.f32.mrf.mxu1 }
 0x13c   :  { %v577_v11 = vpop.f32.mrf.mxu0 }
 0x13d   :  { %1158 = vmatpush1.bf16.msra.mxu0 %v3486_v46  ;;  %1199 = vmatpush1.bf16.msra.mxu1 %v3495_v52  ;;  %v668_v37 = vpop.f32.mrf.mxu1 }
 0x13e   :  { %1159 = vmatprep.subr.bf16.mxu0 %v3489_v50  ;;  %1200 = vmatprep.subr.bf16.mxu1 %v3503_v22  ;;  %v581_v48 = vpop.f32.mrf.mxu0 }
 0x13f   :  { %v670_v54 = vpop.f32.mrf.mxu1 }
 0x140   :  { %v583_v33 = vpop.f32.mrf.mxu0  ;;  %v78_v54 = vld [vmem:[#allocation3 + $0x310] sm:$0x11] }
 0x141   :  { %1160 = vmatpush1.bf16.msra.mxu0 %v3500_v59  ;;  %1201 = vmatpush1.bf16.msra.mxu1 %v3509_v61  ;;  %v674_v53 = vpop.f32.mrf.mxu1  ;;  %v84_v55 = vunpack.c.l.bf16 %v78_v54 }
 0x142   :  { %1161 = vmatprep.subr.bf16.mxu0 %v3507_v60  ;;  %1202 = vmatprep.subr.bf16.mxu1 %v3514_v62  ;;  %v585_v12 = vpop.f32.mrf.mxu0 }
 0x143   :  { %v676_v19 = vpop.f32.mrf.mxu1 }
 0x144   :  { %v587_v11 = vpop.f32.mrf.mxu0 }
 0x145   :  { %1162 = vmatpush1.bf16.msra.mxu0 %v3518_v4  ;;  %1203 = vmatpush1.bf16.msra.mxu1 %v3524_v6  ;;  %v678_v29 = vpop.f32.mrf.mxu1 }
 0x146   :  { %1163 = vmatprep.subr.bf16.mxu0 %v3522_v5  ;;  %1204 = vmatprep.subr.bf16.mxu1 %v3529_v7  ;;  %v591_v48 = vpop.f32.mrf.mxu0 }
 0x147   :  { %v680_v25 = vpop.f32.mrf.mxu1 }
 0x148   :  { %v593_v26 = vpop.f32.mrf.mxu0 }
 0x149   :  { %1164 = vmatpush1.bf16.msra.mxu0 %v3533_v8  ;;  %1205 = vmatpush1.bf16.msra.mxu1 %v3537_v9  ;;  %v684_v37 = vpop.f32.mrf.mxu1  ;;  %v119_v26 = vrot.slane %v84_v55, %v3547_v17 }
 0x14a   :  { %1264 = vmatprep.subr.bf16.mxu0 %v3426_v10  ;;  %1305 = vmatprep.subr.bf16.mxu1 %v3430_v14  ;;  %v595_v20 = vpop.f32.mrf.mxu0 }
 0x14b   :  { %v686_v63 = vpop.f32.mrf.mxu1 }
 0x14c   :  { %v597_v33 = vpop.f32.mrf.mxu0 }
 0x14d   :  { %v688_v47 = vpop.f32.mrf.mxu1 }
 0x14e   :  { %v601_v1 = vpop.f32.mrf.mxu0  ;;  %v79_v47 = vld [vmem:[#allocation3 + $0x318] sm:$0x11] }
 0x14f   :  { %v690_v12 = vpop.f32.mrf.mxu1 }
 0x150   :  { %v603_v0 = vpop.f32.mrf.mxu0 }
 0x151   :  { %v694_v35 = vpop.f32.mrf.mxu1  ;;  %v86_v0 = vunpack.c.l.bf16 %v79_v47 }
 0x152   :  { %v605_v3 = vpop.f32.mrf.mxu0 }
 0x153   :  { %v696_v11 = vpop.f32.mrf.mxu1  ;;  %v127_v3 = vrot.slane %v86_v0, %v3547_v17 }
 0x154   :  { %v607_v34 = vpop.f32.mrf.mxu0 }
 0x155   :  { %v698_v48 = vpop.f32.mrf.mxu1 }
 0x156   :  { %v611_v53 = vpop.f32.mrf.mxu0 }
 0x157   :  { %v700_v20 = vpop.f32.mrf.mxu1 }
 0x158   :  { %v613_v29 = vpop.f32.mrf.mxu0 }
 0x159   :  { %v704_v19 = vpop.f32.mrf.mxu1 }
 0x15a   :  { %v615_v25 = vpop.f32.mrf.mxu0 }
 0x15b   :  { %v616_v33 = vadd.f32 %v615_v25, %v119_v26  ;;  %v706_v63 = vpop.f32.mrf.mxu1 }
 0x15c   :  { %v3740_v48 = vpop.f32.mrf.mxu0 }
 0x15d   :  { %v2865_v1 = vmul.f32 -1.442695, %v616_v33  ;;  %v708_v35 = vpop.f32.mrf.mxu1 }
 0x15e   :  { %v709_v34 = vadd.f32 %v708_v35, %v127_v3 }
 0x15f   :  { %3052 = vpow2.f32 %v2865_v1  ;;  %v3738_v53 = vpop.f32.mrf.mxu1 }
 0x160   :  { %3054 = vtanh.f32 %v709_v34 }
 0x16c   :  { %v3053_v37 = vpop.eup %3052 }
 0x16d   :  { %v2301_v12 = vadd.f32 1.0, %v3053_v37  ;;  %v3055_v54 = vpop.eup %3054 }
 0x16f   :  { %3056 = vrcp.f32 %v2301_v12 }
 0x17c   :  { %v3057_v55 = vpop.eup %3056 }
 0x17d   :  { %v3736_v11 = vmul.f32 %v3057_v55, %v3055_v54 }
 0x1ec   :  { %v1068_v26 = vpop.f32.mrf.mxu0  ;;  %v1109_v29 = vpop.f32.mrf.mxu1 }
 0x1ed   :  { %v1116_v20 = vadd.f32 %v1068_v26, %v3564_v49  ;;  %v1118_v37 = vadd.f32 %v1109_v29, %v3614_v56 }
 0x1ee   :  { %v1070_v25 = vpop.f32.mrf.mxu0  ;;  %v1111_v19 = vpop.f32.mrf.mxu1 }
 0x1ef   :  { %v2832_v33 = vmul.f32 -1.442695, %v1116_v20  ;;  %v1117_v63 = vadd.f32 %v1070_v25, %v3570_v57  ;;  %v1119_v34 = vadd.f32 %v1111_v19, %v3620_v16 }
 0x1f0   :  { %v1072_v1 = vpop.f32.mrf.mxu0  ;;  %v1113_v47 = vpop.f32.mrf.mxu1 }
 0x1f1   :  { %3058 = vpow2.f32 %v2832_v33  ;;  %v2833_v0 = vmul.f32 -1.442695, %v1117_v63  ;;  %v2834_v12 = vmul.f32 -1.442695, %v1119_v34 }
 0x1f2   :  { %v1073_v3 = vpop.f32.mrf.mxu0  ;;  %v1114_v35 = vpop.f32.mrf.mxu1 }
 0x1f3   :  { %3060 = vpow2.f32 %v2833_v0 }
 0x1f4   :  { %3062 = vtanh.f32 %v1118_v37 }
 0x1f5   :  { %3064 = vpow2.f32 %v2834_v12 }
 0x1fe   :  { %v3059_v54 = vpop.eup %3058 }
 0x1ff   :  { %v1123_v55 = vadd.f32 1.0, %v3059_v54 }
 0x200   :  { %v3061_v49 = vpop.eup %3060 }
 0x201   :  { %3066 = vrcp.f32 %v1123_v55  ;;  %v1129_v26 = vadd.f32 1.0, %v3061_v49  ;;  %v3063_v57 = vpop.eup %3062 }
 0x202   :  { %v3065_v20 = vpop.eup %3064 }
 0x203   :  { %3068 = vrcp.f32 %v1129_v26  ;;  %v1136_v1 = vadd.f32 1.0, %v3065_v20 }
 0x205   :  { %3070 = vrcp.f32 %v1136_v1 }
 0x20e   :  { %v3067_v25 = vpop.eup %3066 }
 0x20f   :  { %v1140_v33 = vmul.f32 %v3067_v25, %v3063_v57 }
 0x210   :  { %v3069_v63 = vpop.eup %3068 }
 0x211   :  { %v1139_v47 = vmul.f32 %v3069_v63, %v3658_v43 }
 0x212   :  { %v3071_v56 = vpop.eup %3070 }
 0x213   :  { %v3747_v16 = vadd.f32 %v1140_v33, %v1139_v47 }
 0x215   :  { %3072 = vtanh.f32 %v3747_v16 }
 0x222   :  { %v3073_v29 = vpop.eup %3072 }
 0x223   :  { %v1143_v19 = vmul.f32 %v3073_v29, %v3071_v56 }
 0x225   :  { %v1148_v0 = vpack.c.bf16 %v1143_v19, %v1143_v19 }
 0x227   :  { %1182 = vmatmul.mubr.bf16.vlgmr.msra.gmra.mxu0 %v1148_v0  ;;  %1223 = vmatmul.mubr.bf16.vlgmr.msra.gmra.mxu1 %v1148_v0 }
 0x228   :  { %1265 = vmatpush1.bf16.msra.mxu0 %v3428_v13  ;;  %1306 = vmatpush1.bf16.msra.mxu1 %v3434_v15 }
 0x229   :  { %1266 = vmatprep.subr.bf16.mxu0 %v3438_v18  ;;  %1307 = vmatprep.subr.bf16.mxu1 %v3445_v23 }
 0x22a   :  { %1296 = vmatprep.mubr.bf16.mxu0 %v4203_v58  ;;  %1337 = vmatprep.mubr.bf16.mxu1 %v4203_v58 }
 0x22c   :  { %1267 = vmatpush1.bf16.msra.mxu0 %v3443_v21  ;;  %1308 = vmatpush1.bf16.msra.mxu1 %v3450_v24 }
 0x22d   :  { %1268 = vmatprep.subr.bf16.mxu0 %v3455_v28  ;;  %1309 = vmatprep.subr.bf16.mxu1 %v3461_v31 }
 0x230   :  { %1269 = vmatpush1.bf16.msra.mxu0 %v3457_v30  ;;  %1310 = vmatpush1.bf16.msra.mxu1 %v3463_v32 }
 0x231   :  { %1270 = vmatprep.subr.bf16.mxu0 %v3469_v36  ;;  %1311 = vmatprep.subr.bf16.mxu1 %v3476_v39 }
 0x234   :  { %1271 = vmatpush1.bf16.msra.mxu0 %v3474_v38  ;;  %1312 = vmatpush1.bf16.msra.mxu1 %v3478_v41 }
 0x235   :  { %1272 = vmatprep.subr.bf16.mxu0 %v3484_v45  ;;  %1313 = vmatprep.subr.bf16.mxu1 %v3493_v51 }
 0x238   :  { %1273 = vmatpush1.bf16.msra.mxu0 %v3486_v46  ;;  %1314 = vmatpush1.bf16.msra.mxu1 %v3495_v52 }
 0x239   :  { %1274 = vmatprep.subr.bf16.mxu0 %v3489_v50  ;;  %1315 = vmatprep.subr.bf16.mxu1 %v3503_v22 }
 0x23c   :  { %1275 = vmatpush1.bf16.msra.mxu0 %v3500_v59  ;;  %1316 = vmatpush1.bf16.msra.mxu1 %v3509_v61 }
 0x23d   :  { %1276 = vmatprep.subr.bf16.mxu0 %v3507_v60  ;;  %1317 = vmatprep.subr.bf16.mxu1 %v3514_v62 }
 0x240   :  { %1277 = vmatpush1.bf16.msra.mxu0 %v3518_v4  ;;  %1318 = vmatpush1.bf16.msra.mxu1 %v3524_v6 }
 0x241   :  { %1278 = vmatprep.subr.bf16.mxu0 %v3522_v5  ;;  %1319 = vmatprep.subr.bf16.mxu1 %v3529_v7 }
 0x244   :  { %1279 = vmatpush1.bf16.msra.mxu0 %v3533_v8  ;;  %1320 = vmatpush1.bf16.msra.mxu1 %v3537_v9 }
 0x245   :  { %1379 = vmatprep.subr.bf16.mxu0 %v3426_v10  ;;  %1420 = vmatprep.subr.bf16.mxu1 %v3430_v14 }
 0x2e7   :  { %v1183_v43 = vpop.f32.mrf.mxu0  ;;  %v1224_v3 = vpop.f32.mrf.mxu1 }
 0x2e8   :  { %v1231_v35 = vadd.f32 %v1183_v43, %v3579_v40  ;;  %v1233_v33 = vadd.f32 %v1224_v3, %v3626_v44 }
 0x2e9   :  { %v1185_v34 = vpop.f32.mrf.mxu0  ;;  %v1226_v37 = vpop.f32.mrf.mxu1 }
 0x2ea   :  { %v2835_v12 = vmul.f32 -1.442695, %v1231_v35  ;;  %v1232_v54 = vadd.f32 %v1185_v34, %v3585_v27  ;;  %v1234_v25 = vadd.f32 %v1226_v37, %v3632_v2 }
 0x2eb   :  { %v1187_v55 = vpop.f32.mrf.mxu0  ;;  %v1228_v49 = vpop.f32.mrf.mxu1 }
 0x2ec   :  { %3074 = vpow2.f32 %v2835_v12  ;;  %v2836_v26 = vmul.f32 -1.442695, %v1232_v54  ;;  %v2837_v63 = vmul.f32 -1.442695, %v1234_v25 }
 0x2ed   :  { %v1188_v57 = vpop.f32.mrf.mxu0  ;;  %v1229_v20 = vpop.f32.mrf.mxu1 }
 0x2ee   :  { %3076 = vpow2.f32 %v2836_v26  ;;  %v4205_v20 = vld [vmem:[#allocation21_spill] sm:$0xff] }
 0x2ef   :  { %3078 = vtanh.f32 %v1233_v33 }
 0x2f0   :  { %3080 = vpow2.f32 %v2837_v63 }
 0x2f9   :  { %v3075_v1 = vpop.eup %3074 }
 0x2fa   :  { %v1238_v47 = vadd.f32 1.0, %v3075_v1 }
 0x2fb   :  { %v3077_v40 = vpop.eup %3076 }
 0x2fc   :  { %3082 = vrcp.f32 %v1238_v47  ;;  %v1244_v56 = vadd.f32 1.0, %v3077_v40  ;;  %v3079_v27 = vpop.eup %3078 }
 0x2fd   :  { %v3081_v29 = vpop.eup %3080 }
 0x2fe   :  { %3084 = vrcp.f32 %v1244_v56  ;;  %v1251_v35 = vadd.f32 1.0, %v3081_v29  ;;  %v4206_v56 = vld [vmem:[#allocation30_spill] sm:$0xff]  ;;  %v4207_v29 = vld [vmem:[#allocation28_spill] sm:$0xff] }
 0x300   :  { %3086 = vrcp.f32 %v1251_v35 }
 0x309   :  { %v3083_v19 = vpop.eup %3082 }
 0x30a   :  { %v1255_v0 = vmul.f32 %v3083_v19, %v3079_v27 }
 0x30b   :  { %v3085_v43 = vpop.eup %3084 }
 0x30c   :  { %v1254_v34 = vmul.f32 %v3085_v43, %v3747_v16 }
 0x30d   :  { %v3087_v44 = vpop.eup %3086 }
 0x30e   :  { %v3789_v2 = vadd.f32 %v1255_v0, %v1254_v34 }
 0x310   :  { %3088 = vtanh.f32 %v3789_v2 }
 0x31d   :  { %v3089_v3 = vpop.eup %3088 }
 0x31e   :  { %v1258_v37 = vmul.f32 %v3089_v3, %v3087_v44 }
 0x320   :  { %v1263_v12 = vpack.c.bf16 %v1258_v37, %v1258_v37 }
 0x322   :  { %1297 = vmatmul.mubr.bf16.vlgmr.msra.gmra.mxu0 %v1263_v12  ;;  %1338 = vmatmul.mubr.bf16.vlgmr.msra.gmra.mxu1 %v1263_v12 }
 0x323   :  { %1380 = vmatpush1.bf16.msra.mxu0 %v3428_v13  ;;  %1421 = vmatpush1.bf16.msra.mxu1 %v3434_v15 }
 0x324   :  { %1381 = vmatprep.subr.bf16.mxu0 %v3438_v18  ;;  %1422 = vmatprep.subr.bf16.mxu1 %v3445_v23 }
 0x325   :  { %1411 = vmatprep.mubr.bf16.mxu0 %v4203_v58  ;;  %1452 = vmatprep.mubr.bf16.mxu1 %v4203_v58 }
 0x327   :  { %1382 = vmatpush1.bf16.msra.mxu0 %v3443_v21  ;;  %1423 = vmatpush1.bf16.msra.mxu1 %v3450_v24 }
 0x328   :  { %1383 = vmatprep.subr.bf16.mxu0 %v3455_v28  ;;  %1424 = vmatprep.subr.bf16.mxu1 %v3461_v31 }
 0x32b   :  { %1384 = vmatpush1.bf16.msra.mxu0 %v3457_v30  ;;  %1425 = vmatpush1.bf16.msra.mxu1 %v3463_v32 }
 0x32c   :  { %1385 = vmatprep.subr.bf16.mxu0 %v3469_v36  ;;  %1426 = vmatprep.subr.bf16.mxu1 %v3476_v39 }
 0x32f   :  { %1386 = vmatpush1.bf16.msra.mxu0 %v3474_v38  ;;  %1427 = vmatpush1.bf16.msra.mxu1 %v3478_v41 }
 0x330   :  { %1387 = vmatprep.subr.bf16.mxu0 %v3484_v45  ;;  %1428 = vmatprep.subr.bf16.mxu1 %v3493_v51 }
 0x333   :  { %1388 = vmatpush1.bf16.msra.mxu0 %v3486_v46  ;;  %1429 = vmatpush1.bf16.msra.mxu1 %v3495_v52 }
 0x334   :  { %1389 = vmatprep.subr.bf16.mxu0 %v3489_v50  ;;  %1430 = vmatprep.subr.bf16.mxu1 %v3503_v22 }
 0x337   :  { %1390 = vmatpush1.bf16.msra.mxu0 %v3500_v59  ;;  %1431 = vmatpush1.bf16.msra.mxu1 %v3509_v61 }
 0x338   :  { %1391 = vmatprep.subr.bf16.mxu0 %v3507_v60  ;;  %1432 = vmatprep.subr.bf16.mxu1 %v3514_v62 }
 0x33b   :  { %1392 = vmatpush1.bf16.msra.mxu0 %v3518_v4  ;;  %1433 = vmatpush1.bf16.msra.mxu1 %v3524_v6 }
 0x33c   :  { %1393 = vmatprep.subr.bf16.mxu0 %v3522_v5  ;;  %1434 = vmatprep.subr.bf16.mxu1 %v3529_v7 }
 0x33f   :  { %1394 = vmatpush1.bf16.msra.mxu0 %v3533_v8  ;;  %1435 = vmatpush1.bf16.msra.mxu1 %v3537_v9 }
 0x340   :  { %1494 = vmatprep.subr.bf16.mxu0 %v3426_v10  ;;  %1535 = vmatprep.subr.bf16.mxu1 %v3430_v14 }
 0x3e2   :  { %v1298_v16 = vpop.f32.mrf.mxu0  ;;  %v1339_v54 = vpop.f32.mrf.mxu1 }
 0x3e3   :  { %v1346_v55 = vadd.f32 %v1298_v16, %v3594_v42  ;;  %v1348_v19 = vadd.f32 %v1339_v54, %v4207_v29 }
 0x3e4   :  { %v1300_v49 = vpop.f32.mrf.mxu0  ;;  %v1341_v26 = vpop.f32.mrf.mxu1 }
 0x3e5   :  { %v2838_v57 = vmul.f32 -1.442695, %v1346_v55  ;;  %v1347_v25 = vadd.f32 %v1300_v49, %v4205_v20  ;;  %v1349_v27 = vadd.f32 %v1341_v26, %v4206_v56 }
 0x3e6   :  { %v1302_v33 = vpop.f32.mrf.mxu0  ;;  %v1343_v63 = vpop.f32.mrf.mxu1 }
 0x3e7   :  { %3090 = vpow2.f32 %v2838_v57  ;;  %v2839_v1 = vmul.f32 -1.442695, %v1347_v25  ;;  %v2840_v0 = vmul.f32 -1.442695, %v1349_v27  ;;  %v4208_v63 = vld [vmem:[#allocation22_spill] sm:$0xff]  ;;  %v4209_v27 = vld [vmem:[#allocation23_spill] sm:$0xff] }
 0x3e8   :  { %v1303_v47 = vpop.f32.mrf.mxu0  ;;  %v1344_v40 = vpop.f32.mrf.mxu1 }
 0x3e9   :  { %3092 = vpow2.f32 %v2839_v1 }
 0x3ea   :  { %3094 = vtanh.f32 %v1348_v19 }
 0x3eb   :  { %3096 = vpow2.f32 %v2840_v0 }
 0x3f4   :  { %v3091_v43 = vpop.eup %3090 }
 0x3f5   :  { %v1353_v35 = vadd.f32 1.0, %v3091_v43 }
 0x3f6   :  { %v3093_v42 = vpop.eup %3092 }
 0x3f7   :  { %3098 = vrcp.f32 %v1353_v35  ;;  %v1359_v34 = vadd.f32 1.0, %v3093_v42  ;;  %v3095_v44 = vpop.eup %3094 }
 0x3f8   :  { %v3097_v3 = vpop.eup %3096 }
 0x3f9   :  { %3100 = vrcp.f32 %v1359_v34  ;;  %v1366_v55 = vadd.f32 1.0, %v3097_v3  ;;  %v4210_v34 = vld [vmem:[#allocation33_spill] sm:$0xff]  ;;  %v4211_v3 = vld [vmem:[#allocation32_spill] sm:$0xff] }
 0x3fb   :  { %3102 = vrcp.f32 %v1366_v55 }
 0x404   :  { %v3099_v37 = vpop.eup %3098 }
 0x405   :  { %v1370_v12 = vmul.f32 %v3099_v37, %v3095_v44 }
 0x406   :  { %v3101_v16 = vpop.eup %3100 }
 0x407   :  { %v1369_v49 = vmul.f32 %v3101_v16, %v3789_v2 }
 0x408   :  { %v3103_v54 = vpop.eup %3102 }
 0x409   :  { %v3831_v26 = vadd.f32 %v1370_v12, %v1369_v49 }
 0x40b   :  { %3104 = vtanh.f32 %v3831_v26 }
 0x418   :  { %v3105_v57 = vpop.eup %3104 }
 0x419   :  { %v1373_v20 = vmul.f32 %v3105_v57, %v3103_v54 }
 0x41b   :  { %v1378_v25 = vpack.c.bf16 %v1373_v20, %v1373_v20 }
 0x41d   :  { %1412 = vmatmul.mubr.bf16.vlgmr.msra.gmra.mxu0 %v1378_v25  ;;  %1453 = vmatmul.mubr.bf16.vlgmr.msra.gmra.mxu1 %v1378_v25 }
 0x41e   :  { %1495 = vmatpush1.bf16.msra.mxu0 %v3428_v13  ;;  %1536 = vmatpush1.bf16.msra.mxu1 %v3434_v15 }
 0x41f   :  { %1496 = vmatprep.subr.bf16.mxu0 %v3438_v18  ;;  %1537 = vmatprep.subr.bf16.mxu1 %v3445_v23 }
 0x420   :  { %1526 = vmatprep.mubr.bf16.mxu0 %v4203_v58  ;;  %1567 = vmatprep.mubr.bf16.mxu1 %v4203_v58 }
 0x422   :  { %1497 = vmatpush1.bf16.msra.mxu0 %v3443_v21  ;;  %1538 = vmatpush1.bf16.msra.mxu1 %v3450_v24 }
 0x423   :  { %1498 = vmatprep.subr.bf16.mxu0 %v3455_v28  ;;  %1539 = vmatprep.subr.bf16.mxu1 %v3461_v31 }
 0x426   :  { %1499 = vmatpush1.bf16.msra.mxu0 %v3457_v30  ;;  %1540 = vmatpush1.bf16.msra.mxu1 %v3463_v32 }
 0x427   :  { %1500 = vmatprep.subr.bf16.mxu0 %v3469_v36  ;;  %1541 = vmatprep.subr.bf16.mxu1 %v3476_v39 }
 0x42a   :  { %1501 = vmatpush1.bf16.msra.mxu0 %v3474_v38  ;;  %1542 = vmatpush1.bf16.msra.mxu1 %v3478_v41 }
 0x42b   :  { %1502 = vmatprep.subr.bf16.mxu0 %v3484_v45  ;;  %1543 = vmatprep.subr.bf16.mxu1 %v3493_v51 }
 0x42e   :  { %1503 = vmatpush1.bf16.msra.mxu0 %v3486_v46  ;;  %1544 = vmatpush1.bf16.msra.mxu1 %v3495_v52 }
 0x42f   :  { %1504 = vmatprep.subr.bf16.mxu0 %v3489_v50  ;;  %1545 = vmatprep.subr.bf16.mxu1 %v3503_v22 }
 0x432   :  { %1505 = vmatpush1.bf16.msra.mxu0 %v3500_v59  ;;  %1546 = vmatpush1.bf16.msra.mxu1 %v3509_v61 }
 0x433   :  { %1506 = vmatprep.subr.bf16.mxu0 %v3507_v60  ;;  %1547 = vmatprep.subr.bf16.mxu1 %v3514_v62 }
 0x436   :  { %1507 = vmatpush1.bf16.msra.mxu0 %v3518_v4  ;;  %1548 = vmatpush1.bf16.msra.mxu1 %v3524_v6 }
 0x437   :  { %1508 = vmatprep.subr.bf16.mxu0 %v3522_v5  ;;  %1549 = vmatprep.subr.bf16.mxu1 %v3529_v7 }
 0x43a   :  { %1509 = vmatpush1.bf16.msra.mxu0 %v3533_v8  ;;  %1550 = vmatpush1.bf16.msra.mxu1 %v3537_v9 }
 0x43b   :  { %1609 = vmatprep.subr.bf16.mxu0 %v3426_v10  ;;  %1650 = vmatprep.subr.bf16.mxu1 %v3430_v14 }
 0x4dd   :  { %v1413_v2 = vpop.f32.mrf.mxu0  ;;  %v1454_v33 = vpop.f32.mrf.mxu1 }
 0x4de   :  { %v1461_v1 = vadd.f32 %v1413_v2, %v4208_v63  ;;  %v1463_v37 = vadd.f32 %v1454_v33, %v4211_v3 }
 0x4df   :  { %v1415_v47 = vpop.f32.mrf.mxu0  ;;  %v1456_v40 = vpop.f32.mrf.mxu1 }
 0x4e0   :  { %v2841_v56 = vmul.f32 -1.442695, %v1461_v1  ;;  %v1462_v29 = vadd.f32 %v1415_v47, %v4209_v27  ;;  %v1464_v44 = vadd.f32 %v1456_v40, %v4210_v34 }
 0x4e1   :  { %v1417_v19 = vpop.f32.mrf.mxu0  ;;  %v1458_v0 = vpop.f32.mrf.mxu1 }
 0x4e2   :  { %3106 = vpow2.f32 %v2841_v56  ;;  %v2842_v43 = vmul.f32 -1.442695, %v1462_v29  ;;  %v2843_v12 = vmul.f32 -1.442695, %v1464_v44  ;;  %v4212_v0 = vld [vmem:[#allocation24_spill] sm:$0xff]  ;;  %v4213_v44 = vld [vmem:[#allocation25_spill] sm:$0xff] }
 0x4e3   :  { %v1418_v35 = vpop.f32.mrf.mxu0  ;;  %v1459_v42 = vpop.f32.mrf.mxu1 }
 0x4e4   :  { %3108 = vpow2.f32 %v2842_v43 }
 0x4e5   :  { %3110 = vtanh.f32 %v1463_v37 }
 0x4e6   :  { %3112 = vpow2.f32 %v2843_v12 }
 0x4ef   :  { %v3107_v16 = vpop.eup %3106 }
 0x4f0   :  { %v1468_v55 = vadd.f32 1.0, %v3107_v16 }
 0x4f1   :  { %v3109_v49 = vpop.eup %3108 }
 0x4f2   :  { %3114 = vrcp.f32 %v1468_v55  ;;  %v1474_v54 = vadd.f32 1.0, %v3109_v49  ;;  %v3111_v57 = vpop.eup %3110 }
 0x4f3   :  { %v3113_v20 = vpop.eup %3112 }
 0x4f4   :  { %3116 = vrcp.f32 %v1474_v54  ;;  %v1481_v1 = vadd.f32 1.0, %v3113_v20  ;;  %v4214_v54 = vld [vmem:[#allocation35_spill] sm:$0xff]  ;;  %v4215_v20 = vld [vmem:[#allocation34_spill] sm:$0xff] }
 0x4f6   :  { %3118 = vrcp.f32 %v1481_v1 }
 0x4ff   :  { %v3115_v25 = vpop.eup %3114 }
 0x500   :  { %v1485_v2 = vmul.f32 %v3115_v25, %v3111_v57 }
 0x501   :  { %v3117_v63 = vpop.eup %3116 }
 0x502   :  { %v1484_v47 = vmul.f32 %v3117_v63, %v3831_v26 }
 0x503   :  { %v3119_v33 = vpop.eup %3118 }
 0x504   :  { %v3873_v40 = vadd.f32 %v1485_v2, %v1484_v47 }
 0x506   :  { %3120 = vtanh.f32 %v3873_v40 }
 0x513   :  { %v3121_v56 = vpop.eup %3120 }
 0x514   :  { %v1488_v27 = vmul.f32 %v3121_v56, %v3119_v33 }
 0x516   :  { %v1493_v29 = vpack.c.bf16 %v1488_v27, %v1488_v27 }
 0x518   :  { %1527 = vmatmul.mubr.bf16.vlgmr.msra.gmra.mxu0 %v1493_v29  ;;  %1568 = vmatmul.mubr.bf16.vlgmr.msra.gmra.mxu1 %v1493_v29 }
 0x519   :  { %1610 = vmatpush1.bf16.msra.mxu0 %v3428_v13  ;;  %1651 = vmatpush1.bf16.msra.mxu1 %v3434_v15 }
 0x51a   :  { %1611 = vmatprep.subr.bf16.mxu0 %v3438_v18  ;;  %1652 = vmatprep.subr.bf16.mxu1 %v3445_v23 }
 0x51b   :  { %1641 = vmatprep.mubr.bf16.mxu0 %v4203_v58  ;;  %1682 = vmatprep.mubr.bf16.mxu1 %v4203_v58 }
 0x51d   :  { %1612 = vmatpush1.bf16.msra.mxu0 %v3443_v21  ;;  %1653 = vmatpush1.bf16.msra.mxu1 %v3450_v24 }
 0x51e   :  { %1613 = vmatprep.subr.bf16.mxu0 %v3455_v28  ;;  %1654 = vmatprep.subr.bf16.mxu1 %v3461_v31 }
 0x521   :  { %1614 = vmatpush1.bf16.msra.mxu0 %v3457_v30  ;;  %1655 = vmatpush1.bf16.msra.mxu1 %v3463_v32 }
 0x522   :  { %1615 = vmatprep.subr.bf16.mxu0 %v3469_v36  ;;  %1656 = vmatprep.subr.bf16.mxu1 %v3476_v39 }
 0x525   :  { %1616 = vmatpush1.bf16.msra.mxu0 %v3474_v38  ;;  %1657 = vmatpush1.bf16.msra.mxu1 %v3478_v41 }
 0x526   :  { %1617 = vmatprep.subr.bf16.mxu0 %v3484_v45  ;;  %1658 = vmatprep.subr.bf16.mxu1 %v3493_v51 }
 0x529   :  { %1618 = vmatpush1.bf16.msra.mxu0 %v3486_v46  ;;  %1659 = vmatpush1.bf16.msra.mxu1 %v3495_v52 }
 0x52a   :  { %1619 = vmatprep.subr.bf16.mxu0 %v3489_v50  ;;  %1660 = vmatprep.subr.bf16.mxu1 %v3503_v22 }
 0x52d   :  { %1620 = vmatpush1.bf16.msra.mxu0 %v3500_v59  ;;  %1661 = vmatpush1.bf16.msra.mxu1 %v3509_v61 }
 0x52e   :  { %1621 = vmatprep.subr.bf16.mxu0 %v3507_v60  ;;  %1662 = vmatprep.subr.bf16.mxu1 %v3514_v62 }
 0x531   :  { %1622 = vmatpush1.bf16.msra.mxu0 %v3518_v4  ;;  %1663 = vmatpush1.bf16.msra.mxu1 %v3524_v6 }
 0x532   :  { %1623 = vmatprep.subr.bf16.mxu0 %v3522_v5  ;;  %1664 = vmatprep.subr.bf16.mxu1 %v3529_v7 }
 0x535   :  { %1624 = vmatpush1.bf16.msra.mxu0 %v3533_v8  ;;  %1665 = vmatpush1.bf16.msra.mxu1 %v3537_v9 }
 0x536   :  { %1724 = vmatprep.subr.bf16.mxu0 %v3426_v10  ;;  %1765 = vmatprep.subr.bf16.mxu1 %v3430_v14 }
 0x5d8   :  { %v1528_v26 = vpop.f32.mrf.mxu0  ;;  %v1569_v19 = vpop.f32.mrf.mxu1 }
 0x5d9   :  { %v1576_v43 = vadd.f32 %v1528_v26, %v4212_v0  ;;  %v1578_v25 = vadd.f32 %v1569_v19, %v4215_v20 }
 0x5da   :  { %v1530_v35 = vpop.f32.mrf.mxu0  ;;  %v1571_v42 = vpop.f32.mrf.mxu1 }
 0x5db   :  { %v2844_v34 = vmul.f32 -1.442695, %v1576_v43  ;;  %v1577_v3 = vadd.f32 %v1530_v35, %v4213_v44  ;;  %v1579_v57 = vadd.f32 %v1571_v42, %v4214_v54 }
 0x5dc   :  { %v1532_v37 = vpop.f32.mrf.mxu0  ;;  %v1573_v12 = vpop.f32.mrf.mxu1 }
 0x5dd   :  { %3122 = vpow2.f32 %v2844_v34  ;;  %v2845_v16 = vmul.f32 -1.442695, %v1577_v3  ;;  %v2846_v2 = vmul.f32 -1.442695, %v1579_v57  ;;  %v4216_v12 = vld [vmem:[#allocation26_spill] sm:$0xff]  ;;  %v4217_v57 = vld [vmem:[#allocation27_spill] sm:$0xff] }
 0x5de   :  { %v1533_v55 = vpop.f32.mrf.mxu0  ;;  %v1574_v49 = vpop.f32.mrf.mxu1 }
 0x5df   :  { %3124 = vpow2.f32 %v2845_v16 }
 0x5e0   :  { %3126 = vtanh.f32 %v1578_v25 }
 0x5e1   :  { %3128 = vpow2.f32 %v2846_v2 }
 0x5ea   :  { %v3123_v63 = vpop.eup %3122 }
 0x5eb   :  { %v1583_v1 = vadd.f32 1.0, %v3123_v63 }
 0x5ec   :  { %v3125_v47 = vpop.eup %3124 }
 0x5ed   :  { %3130 = vrcp.f32 %v1583_v1  ;;  %v1589_v33 = vadd.f32 1.0, %v3125_v47  ;;  %v3127_v56 = vpop.eup %3126 }
 0x5ee   :  { %v3129_v27 = vpop.eup %3128 }
 0x5ef   :  { %3132 = vrcp.f32 %v1589_v33  ;;  %v1596_v43 = vadd.f32 1.0, %v3129_v27  ;;  %v4218_v33 = vld [vmem:[#allocation37_spill] sm:$0xff]  ;;  %v4219_v27 = vld [vmem:[#allocation36_spill] sm:$0xff] }
 0x5f1   :  { %3134 = vrcp.f32 %v1596_v43 }
 0x5fa   :  { %v3131_v29 = vpop.eup %3130 }
 0x5fb   :  { %v1600_v26 = vmul.f32 %v3131_v29, %v3127_v56 }
 0x5fc   :  { %v3133_v0 = vpop.eup %3132 }
 0x5fd   :  { %v1599_v35 = vmul.f32 %v3133_v0, %v3873_v40 }
 0x5fe   :  { %v3135_v19 = vpop.eup %3134 }
 0x5ff   :  { %v3915_v42 = vadd.f32 %v1600_v26, %v1599_v35 }
 0x601   :  { %3136 = vtanh.f32 %v3915_v42 }
 0x60e   :  { %v3137_v34 = vpop.eup %3136 }
 0x60f   :  { %v1603_v44 = vmul.f32 %v3137_v34, %v3135_v19 }
 0x611   :  { %v1608_v3 = vpack.c.bf16 %v1603_v44, %v1603_v44 }
 0x613   :  { %1642 = vmatmul.mubr.bf16.vlgmr.msra.gmra.mxu0 %v1608_v3  ;;  %1683 = vmatmul.mubr.bf16.vlgmr.msra.gmra.mxu1 %v1608_v3 }
 0x614   :  { %1725 = vmatpush1.bf16.msra.mxu0 %v3428_v13  ;;  %1766 = vmatpush1.bf16.msra.mxu1 %v3434_v15 }
 0x615   :  { %1726 = vmatprep.subr.bf16.mxu0 %v3438_v18  ;;  %1767 = vmatprep.subr.bf16.mxu1 %v3445_v23 }
 0x616   :  { %1756 = vmatprep.mubr.bf16.mxu0 %v4203_v58  ;;  %1797 = vmatprep.mubr.bf16.mxu1 %v4203_v58 }
 0x618   :  { %1727 = vmatpush1.bf16.msra.mxu0 %v3443_v21  ;;  %1768 = vmatpush1.bf16.msra.mxu1 %v3450_v24 }
 0x619   :  { %1728 = vmatprep.subr.bf16.mxu0 %v3455_v28  ;;  %1769 = vmatprep.subr.bf16.mxu1 %v3461_v31 }
 0x61c   :  { %1729 = vmatpush1.bf16.msra.mxu0 %v3457_v30  ;;  %1770 = vmatpush1.bf16.msra.mxu1 %v3463_v32 }
 0x61d   :  { %1730 = vmatprep.subr.bf16.mxu0 %v3469_v36  ;;  %1771 = vmatprep.subr.bf16.mxu1 %v3476_v39 }
 0x620   :  { %1731 = vmatpush1.bf16.msra.mxu0 %v3474_v38  ;;  %1772 = vmatpush1.bf16.msra.mxu1 %v3478_v41 }
 0x621   :  { %1732 = vmatprep.subr.bf16.mxu0 %v3484_v45  ;;  %1773 = vmatprep.subr.bf16.mxu1 %v3493_v51 }
 0x624   :  { %1733 = vmatpush1.bf16.msra.mxu0 %v3486_v46  ;;  %1774 = vmatpush1.bf16.msra.mxu1 %v3495_v52 }
 0x625   :  { %1734 = vmatprep.subr.bf16.mxu0 %v3489_v50  ;;  %1775 = vmatprep.subr.bf16.mxu1 %v3503_v22 }
 0x628   :  { %1735 = vmatpush1.bf16.msra.mxu0 %v3500_v59  ;;  %1776 = vmatpush1.bf16.msra.mxu1 %v3509_v61 }
 0x629   :  { %1736 = vmatprep.subr.bf16.mxu0 %v3507_v60  ;;  %1777 = vmatprep.subr.bf16.mxu1 %v3514_v62 }
 0x62c   :  { %1737 = vmatpush1.bf16.msra.mxu0 %v3518_v4  ;;  %1778 = vmatpush1.bf16.msra.mxu1 %v3524_v6 }
 0x62d   :  { %1738 = vmatprep.subr.bf16.mxu0 %v3522_v5  ;;  %1779 = vmatprep.subr.bf16.mxu1 %v3529_v7 }
 0x630   :  { %1739 = vmatpush1.bf16.msra.mxu0 %v3533_v8  ;;  %1780 = vmatpush1.bf16.msra.mxu1 %v3537_v9 }
 0x631   :  { %1839 = vmatprep.subr.bf16.mxu0 %v3426_v10  ;;  %1880 = vmatprep.subr.bf16.mxu1 %v3430_v14 }
 0x6d3   :  { %v1643_v40 = vpop.f32.mrf.mxu0  ;;  %v1684_v37 = vpop.f32.mrf.mxu1 }
 0x6d4   :  { %v1691_v16 = vadd.f32 %v1643_v40, %v4216_v12  ;;  %v1693_v29 = vadd.f32 %v1684_v37, %v4219_v27 }
 0x6d5   :  { %v1645_v55 = vpop.f32.mrf.mxu0  ;;  %v1686_v49 = vpop.f32.mrf.mxu1 }
 0x6d6   :  { %v2847_v54 = vmul.f32 -1.442695, %v1691_v16  ;;  %v1692_v20 = vadd.f32 %v1645_v55, %v4217_v57  ;;  %v1694_v56 = vadd.f32 %v1686_v49, %v4218_v33 }
 0x6d7   :  { %v1647_v25 = vpop.f32.mrf.mxu0  ;;  %v1688_v2 = vpop.f32.mrf.mxu1 }
 0x6d8   :  { %3138 = vpow2.f32 %v2847_v54  ;;  %v2848_v63 = vmul.f32 -1.442695, %v1692_v20  ;;  %v2849_v26 = vmul.f32 -1.442695, %v1694_v56  ;;  %v4220_v2 = vld [vmem:[#allocation29_spill] sm:$0xff]  ;;  %v4221_v56 = vld [vmem:[#allocation31_spill] sm:$0xff] }
 0x6d9   :  { %v1648_v1 = vpop.f32.mrf.mxu0  ;;  %v1689_v47 = vpop.f32.mrf.mxu1 }
 0x6da   :  { %3140 = vpow2.f32 %v2848_v63 }
 0x6db   :  { %3142 = vtanh.f32 %v1693_v29 }
 0x6dc   :  { %3144 = vpow2.f32 %v2849_v26 }
 0x6e5   :  { %v3139_v0 = vpop.eup %3138 }
 0x6e6   :  { %v1698_v43 = vadd.f32 1.0, %v3139_v0 }
 0x6e7   :  { %v3141_v35 = vpop.eup %3140 }
 0x6e8   :  { %3146 = vrcp.f32 %v1698_v43  ;;  %v1704_v19 = vadd.f32 1.0, %v3141_v35  ;;  %v3143_v34 = vpop.eup %3142 }
 0x6e9   :  { %v3145_v44 = vpop.eup %3144 }
 0x6ea   :  { %3148 = vrcp.f32 %v1704_v19  ;;  %v1711_v16 = vadd.f32 1.0, %v3145_v44  ;;  %v4222_v19 = vld [vmem:[#allocation39_spill] sm:$0xff]  ;;  %v4223_v44 = vld [vmem:[#allocation38_spill] sm:$0xff] }
 0x6ec   :  { %3150 = vrcp.f32 %v1711_v16 }
 0x6f5   :  { %v3147_v3 = vpop.eup %3146 }
 0x6f6   :  { %v1715_v40 = vmul.f32 %v3147_v3, %v3143_v34 }
 0x6f7   :  { %v3149_v12 = vpop.eup %3148 }
 0x6f8   :  { %v1714_v55 = vmul.f32 %v3149_v12, %v3915_v42 }
 0x6f9   :  { %v3151_v37 = vpop.eup %3150 }
 0x6fa   :  { %v3957_v49 = vadd.f32 %v1715_v40, %v1714_v55 }
 0x6fc   :  { %3152 = vtanh.f32 %v3957_v49 }
 0x709   :  { %v3153_v54 = vpop.eup %3152 }
 0x70a   :  { %v1718_v57 = vmul.f32 %v3153_v54, %v3151_v37 }
 0x70c   :  { %v1723_v20 = vpack.c.bf16 %v1718_v57, %v1718_v57 }
 0x70e   :  { %1757 = vmatmul.mubr.bf16.vlgmr.msra.gmra.mxu0 %v1723_v20  ;;  %1798 = vmatmul.mubr.bf16.vlgmr.msra.gmra.mxu1 %v1723_v20 }
 0x70f   :  { %1840 = vmatpush1.bf16.msra.mxu0 %v3428_v13  ;;  %1881 = vmatpush1.bf16.msra.mxu1 %v3434_v15 }
 0x710   :  { %1841 = vmatprep.subr.bf16.mxu0 %v3438_v18  ;;  %1882 = vmatprep.subr.bf16.mxu1 %v3445_v23 }
 0x711   :  { %1871 = vmatprep.mubr.bf16.mxu0 %v4203_v58  ;;  %1912 = vmatprep.mubr.bf16.mxu1 %v4203_v58 }
 0x713   :  { %1842 = vmatpush1.bf16.msra.mxu0 %v3443_v21  ;;  %1883 = vmatpush1.bf16.msra.mxu1 %v3450_v24 }
 0x714   :  { %1843 = vmatprep.subr.bf16.mxu0 %v3455_v28  ;;  %1884 = vmatprep.subr.bf16.mxu1 %v3461_v31 }
 0x717   :  { %1844 = vmatpush1.bf16.msra.mxu0 %v3457_v30  ;;  %1885 = vmatpush1.bf16.msra.mxu1 %v3463_v32 }
 0x718   :  { %1845 = vmatprep.subr.bf16.mxu0 %v3469_v36  ;;  %1886 = vmatprep.subr.bf16.mxu1 %v3476_v39 }
 0x71b   :  { %1846 = vmatpush1.bf16.msra.mxu0 %v3474_v38  ;;  %1887 = vmatpush1.bf16.msra.mxu1 %v3478_v41 }
 0x71c   :  { %1847 = vmatprep.subr.bf16.mxu0 %v3484_v45  ;;  %1888 = vmatprep.subr.bf16.mxu1 %v3493_v51 }
 0x71f   :  { %1848 = vmatpush1.bf16.msra.mxu0 %v3486_v46  ;;  %1889 = vmatpush1.bf16.msra.mxu1 %v3495_v52 }
 0x720   :  { %1849 = vmatprep.subr.bf16.mxu0 %v3489_v50  ;;  %1890 = vmatprep.subr.bf16.mxu1 %v3503_v22 }
 0x723   :  { %1850 = vmatpush1.bf16.msra.mxu0 %v3500_v59  ;;  %1891 = vmatpush1.bf16.msra.mxu1 %v3509_v61 }
 0x724   :  { %1851 = vmatprep.subr.bf16.mxu0 %v3507_v60  ;;  %1892 = vmatprep.subr.bf16.mxu1 %v3514_v62 }
 0x727   :  { %1852 = vmatpush1.bf16.msra.mxu0 %v3518_v4  ;;  %1893 = vmatpush1.bf16.msra.mxu1 %v3524_v6 }
 0x728   :  { %1853 = vmatprep.subr.bf16.mxu0 %v3522_v5  ;;  %1894 = vmatprep.subr.bf16.mxu1 %v3529_v7 }
 0x72b   :  { %1854 = vmatpush1.bf16.msra.mxu0 %v3533_v8  ;;  %1895 = vmatpush1.bf16.msra.mxu1 %v3537_v9 }
 0x72c   :  { %1954 = vmatprep.subr.bf16.mxu0 %v3426_v10  ;;  %1995 = vmatprep.subr.bf16.mxu1 %v3430_v14 }
 0x7ce   :  { %v1758_v42 = vpop.f32.mrf.mxu0  ;;  %v1799_v25 = vpop.f32.mrf.mxu1 }
 0x7cf   :  { %v1806_v63 = vadd.f32 %v1758_v42, %v4220_v2  ;;  %v1808_v3 = vadd.f32 %v1799_v25, %v4223_v44 }
 0x7d0   :  { %v1760_v1 = vpop.f32.mrf.mxu0  ;;  %v1801_v47 = vpop.f32.mrf.mxu1 }
 0x7d1   :  { %v2850_v33 = vmul.f32 -1.442695, %v1806_v63  ;;  %v1807_v27 = vadd.f32 %v1760_v1, %v4221_v56  ;;  %v1809_v34 = vadd.f32 %v1801_v47, %v4222_v19 }
 0x7d2   :  { %v1762_v29 = vpop.f32.mrf.mxu0  ;;  %v1803_v26 = vpop.f32.mrf.mxu1 }
 0x7d3   :  { %3154 = vpow2.f32 %v2850_v33  ;;  %v2851_v0 = vmul.f32 -1.442695, %v1807_v27  ;;  %v2852_v40 = vmul.f32 -1.442695, %v1809_v34  ;;  %v4224_v26 = vld [vmem:[#allocation13_spill] sm:$0xff]  ;;  %v4225_v34 = vld [vmem:[#allocation14_spill] sm:$0xff] }
 0x7d4   :  { %v1763_v43 = vpop.f32.mrf.mxu0  ;;  %v1804_v35 = vpop.f32.mrf.mxu1 }
 0x7d5   :  { %3156 = vpow2.f32 %v2851_v0 }
 0x7d6   :  { %3158 = vtanh.f32 %v1808_v3 }
 0x7d7   :  { %3160 = vpow2.f32 %v2852_v40 }
 0x7e0   :  { %v3155_v12 = vpop.eup %3154 }
 0x7e1   :  { %v1813_v16 = vadd.f32 1.0, %v3155_v12 }
 0x7e2   :  { %v3157_v55 = vpop.eup %3156 }
 0x7e3   :  { %3162 = vrcp.f32 %v1813_v16  ;;  %v1819_v37 = vadd.f32 1.0, %v3157_v55  ;;  %v3159_v54 = vpop.eup %3158 }
 0x7e4   :  { %v3161_v57 = vpop.eup %3160 }
 0x7e5   :  { %3164 = vrcp.f32 %v1819_v37  ;;  %v1826_v63 = vadd.f32 1.0, %v3161_v57  ;;  %v4226_v37 = vld [vmem:[#allocation41_spill] sm:$0xff]  ;;  %v4227_v57 = vld [vmem:[#allocation40_spill] sm:$0xff] }
 0x7e7   :  { %3166 = vrcp.f32 %v1826_v63 }
 0x7f0   :  { %v3163_v20 = vpop.eup %3162 }
 0x7f1   :  { %v1830_v42 = vmul.f32 %v3163_v20, %v3159_v54 }
 0x7f2   :  { %v3165_v2 = vpop.eup %3164 }
 0x7f3   :  { %v1829_v1 = vmul.f32 %v3165_v2, %v3957_v49 }
 0x7f4   :  { %v3167_v25 = vpop.eup %3166 }
 0x7f5   :  { %v3999_v47 = vadd.f32 %v1830_v42, %v1829_v1 }
 0x7f7   :  { %3168 = vtanh.f32 %v3999_v47 }
 0x804   :  { %v3169_v33 = vpop.eup %3168 }
 0x805   :  { %v1833_v56 = vmul.f32 %v3169_v33, %v3167_v25 }
 0x807   :  { %v1838_v27 = vpack.c.bf16 %v1833_v56, %v1833_v56 }
 0x809   :  { %1872 = vmatmul.mubr.bf16.vlgmr.msra.gmra.mxu0 %v1838_v27  ;;  %1913 = vmatmul.mubr.bf16.vlgmr.msra.gmra.mxu1 %v1838_v27 }
 0x80a   :  { %1955 = vmatpush1.bf16.msra.mxu0 %v3428_v13  ;;  %1996 = vmatpush1.bf16.msra.mxu1 %v3434_v15 }
 0x80b   :  { %1956 = vmatprep.subr.bf16.mxu0 %v3438_v18  ;;  %1997 = vmatprep.subr.bf16.mxu1 %v3445_v23 }
 0x80c   :  { %1986 = vmatprep.mubr.bf16.mxu0 %v4203_v58  ;;  %2027 = vmatprep.mubr.bf16.mxu1 %v4203_v58 }
 0x80e   :  { %1957 = vmatpush1.bf16.msra.mxu0 %v3443_v21  ;;  %1998 = vmatpush1.bf16.msra.mxu1 %v3450_v24 }
 0x80f   :  { %1958 = vmatprep.subr.bf16.mxu0 %v3455_v28  ;;  %1999 = vmatprep.subr.bf16.mxu1 %v3461_v31 }
 0x812   :  { %1959 = vmatpush1.bf16.msra.mxu0 %v3457_v30  ;;  %2000 = vmatpush1.bf16.msra.mxu1 %v3463_v32 }
 0x813   :  { %1960 = vmatprep.subr.bf16.mxu0 %v3469_v36  ;;  %2001 = vmatprep.subr.bf16.mxu1 %v3476_v39 }
 0x816   :  { %1961 = vmatpush1.bf16.msra.mxu0 %v3474_v38  ;;  %2002 = vmatpush1.bf16.msra.mxu1 %v3478_v41 }
 0x817   :  { %1962 = vmatprep.subr.bf16.mxu0 %v3484_v45  ;;  %2003 = vmatprep.subr.bf16.mxu1 %v3493_v51 }
 0x81a   :  { %1963 = vmatpush1.bf16.msra.mxu0 %v3486_v46  ;;  %2004 = vmatpush1.bf16.msra.mxu1 %v3495_v52 }
 0x81b   :  { %1964 = vmatprep.subr.bf16.mxu0 %v3489_v50  ;;  %2005 = vmatprep.subr.bf16.mxu1 %v3503_v22 }
 0x81e   :  { %1965 = vmatpush1.bf16.msra.mxu0 %v3500_v59  ;;  %2006 = vmatpush1.bf16.msra.mxu1 %v3509_v61 }
 0x81f   :  { %1966 = vmatprep.subr.bf16.mxu0 %v3507_v60  ;;  %2007 = vmatprep.subr.bf16.mxu1 %v3514_v62 }
 0x822   :  { %1967 = vmatpush1.bf16.msra.mxu0 %v3518_v4  ;;  %2008 = vmatpush1.bf16.msra.mxu1 %v3524_v6 }
 0x823   :  { %1968 = vmatprep.subr.bf16.mxu0 %v3522_v5  ;;  %2009 = vmatprep.subr.bf16.mxu1 %v3529_v7 }
 0x826   :  { %1969 = vmatpush1.bf16.msra.mxu0 %v3533_v8  ;;  %2010 = vmatpush1.bf16.msra.mxu1 %v3537_v9 }
 0x827   :  { %2069 = vmatprep.subr.bf16.mxu0 %v3426_v10  ;;  %2110 = vmatprep.subr.bf16.mxu1 %v3430_v14 }
 0x8c9   :  { %v1873_v49 = vpop.f32.mrf.mxu0  ;;  %v1914_v29 = vpop.f32.mrf.mxu1 }
 0x8ca   :  { %v1921_v0 = vadd.f32 %v1873_v49, %v4224_v26  ;;  %v1923_v20 = vadd.f32 %v1914_v29, %v4227_v57 }
 0x8cb   :  { %v1875_v43 = vpop.f32.mrf.mxu0  ;;  %v1916_v35 = vpop.f32.mrf.mxu1 }
 0x8cc   :  { %v2853_v19 = vmul.f32 -1.442695, %v1921_v0  ;;  %v1922_v44 = vadd.f32 %v1875_v43, %v4225_v34  ;;  %v1924_v54 = vadd.f32 %v1916_v35, %v4226_v37 }
 0x8cd   :  { %v1877_v3 = vpop.f32.mrf.mxu0  ;;  %v1918_v40 = vpop.f32.mrf.mxu1 }
 0x8ce   :  { %3170 = vpow2.f32 %v2853_v19  ;;  %v2854_v12 = vmul.f32 -1.442695, %v1922_v44  ;;  %v2855_v42 = vmul.f32 -1.442695, %v1924_v54  ;;  %v4228_v40 = vld [vmem:[#allocation15_spill] sm:$0xff]  ;;  %v4229_v54 = vld [vmem:[#allocation16_spill] sm:$0xff] }
 0x8cf   :  { %v1878_v16 = vpop.f32.mrf.mxu0  ;;  %v1919_v55 = vpop.f32.mrf.mxu1 }
 0x8d0   :  { %3172 = vpow2.f32 %v2854_v12 }
 0x8d1   :  { %3174 = vtanh.f32 %v1923_v20 }
 0x8d2   :  { %3176 = vpow2.f32 %v2855_v42 }
 0x8db   :  { %v3171_v2 = vpop.eup %3170 }
 0x8dc   :  { %v1928_v63 = vadd.f32 1.0, %v3171_v2 }
 0x8dd   :  { %v3173_v1 = vpop.eup %3172 }
 0x8de   :  { %3178 = vrcp.f32 %v1928_v63  ;;  %v1934_v25 = vadd.f32 1.0, %v3173_v1  ;;  %v3175_v33 = vpop.eup %3174 }
 0x8df   :  { %v3177_v56 = vpop.eup %3176 }
 0x8e0   :  { %3180 = vrcp.f32 %v1934_v25  ;;  %v1941_v0 = vadd.f32 1.0, %v3177_v56  ;;  %v4230_v25 = vld [vmem:[#allocation43_spill] sm:$0xff] }
 0x8e2   :  { %3182 = vrcp.f32 %v1941_v0 }
 0x8eb   :  { %v3179_v27 = vpop.eup %3178 }
 0x8ec   :  { %v1945_v49 = vmul.f32 %v3179_v27, %v3175_v33  ;;  %v4231_v33 = vld [vmem:[#allocation42_spill] sm:$0xff] }
 0x8ed   :  { %v3181_v26 = vpop.eup %3180 }
 0x8ee   :  { %v1944_v43 = vmul.f32 %v3181_v26, %v3999_v47 }
 0x8ef   :  { %v3183_v29 = vpop.eup %3182 }
 0x8f0   :  { %v4041_v35 = vadd.f32 %v1945_v49, %v1944_v43 }
 0x8f2   :  { %3184 = vtanh.f32 %v4041_v35 }
 0x8ff   :  { %v3185_v19 = vpop.eup %3184 }
 0x900   :  { %v1948_v34 = vmul.f32 %v3185_v19, %v3183_v29 }
 0x902   :  { %v1953_v44 = vpack.c.bf16 %v1948_v34, %v1948_v34 }
 0x904   :  { %1987 = vmatmul.mubr.bf16.vlgmr.msra.gmra.mxu0 %v1953_v44  ;;  %2028 = vmatmul.mubr.bf16.vlgmr.msra.gmra.mxu1 %v1953_v44 }
 0x905   :  { %2070 = vmatpush1.bf16.msra.mxu0 %v3428_v13  ;;  %2111 = vmatpush1.bf16.msra.mxu1 %v3434_v15 }
 0x906   :  { %2071 = vmatprep.subr.bf16.mxu0 %v3438_v18  ;;  %2112 = vmatprep.subr.bf16.mxu1 %v3445_v23 }
 0x907   :  { %2101 = vmatprep.mubr.bf16.mxu0 %v4203_v58  ;;  %2142 = vmatprep.mubr.bf16.mxu1 %v4203_v58 }
 0x909   :  { %2072 = vmatpush1.bf16.msra.mxu0 %v3443_v21  ;;  %2113 = vmatpush1.bf16.msra.mxu1 %v3450_v24 }
 0x90a   :  { %2073 = vmatprep.subr.bf16.mxu0 %v3455_v28  ;;  %2114 = vmatprep.subr.bf16.mxu1 %v3461_v31 }
 0x90d   :  { %2074 = vmatpush1.bf16.msra.mxu0 %v3457_v30  ;;  %2115 = vmatpush1.bf16.msra.mxu1 %v3463_v32 }
 0x90e   :  { %2075 = vmatprep.subr.bf16.mxu0 %v3469_v36  ;;  %2116 = vmatprep.subr.bf16.mxu1 %v3476_v39 }
 0x911   :  { %2076 = vmatpush1.bf16.msra.mxu0 %v3474_v38  ;;  %2117 = vmatpush1.bf16.msra.mxu1 %v3478_v41 }
 0x912   :  { %2077 = vmatprep.subr.bf16.mxu0 %v3484_v45  ;;  %2118 = vmatprep.subr.bf16.mxu1 %v3493_v51 }
 0x915   :  { %2078 = vmatpush1.bf16.msra.mxu0 %v3486_v46  ;;  %2119 = vmatpush1.bf16.msra.mxu1 %v3495_v52 }
 0x916   :  { %2079 = vmatprep.subr.bf16.mxu0 %v3489_v50  ;;  %2120 = vmatprep.subr.bf16.mxu1 %v3503_v22 }
 0x919   :  { %2080 = vmatpush1.bf16.msra.mxu0 %v3500_v59  ;;  %2121 = vmatpush1.bf16.msra.mxu1 %v3509_v61 }
 0x91a   :  { %2081 = vmatprep.subr.bf16.mxu0 %v3507_v60  ;;  %2122 = vmatprep.subr.bf16.mxu1 %v3514_v62 }
 0x91d   :  { %2082 = vmatpush1.bf16.msra.mxu0 %v3518_v4  ;;  %2123 = vmatpush1.bf16.msra.mxu1 %v3524_v6 }
 0x91e   :  { %2083 = vmatprep.subr.bf16.mxu0 %v3522_v5  ;;  %2124 = vmatprep.subr.bf16.mxu1 %v3529_v7 }
 0x921   :  { %2084 = vmatpush1.bf16.msra.mxu0 %v3533_v8  ;;  %2125 = vmatpush1.bf16.msra.mxu1 %v3537_v9 }
 0x922   :  { %2184 = vmatprep.subr.bf16.mxu0 %v3426_v10  ;;  %2225 = vmatprep.subr.bf16.mxu1 %v3430_v14 }
 0x9c4   :  { %v1988_v47 = vpop.f32.mrf.mxu0  ;;  %v2029_v3 = vpop.f32.mrf.mxu1 }
 0x9c5   :  { %v2036_v12 = vadd.f32 %v1988_v47, %v4228_v40  ;;  %v2038_v14 = vadd.f32 %v2029_v3, %v4231_v33 }
 0x9c6   :  { %v1990_v16 = vpop.f32.mrf.mxu0  ;;  %v2031_v55 = vpop.f32.mrf.mxu1 }
 0x9c7   :  { %v2856_v37 = vmul.f32 -1.442695, %v2036_v12  ;;  %v2037_v57 = vadd.f32 %v1990_v16, %v4229_v54  ;;  %v2039_v10 = vadd.f32 %v2031_v55, %v4230_v25 }
 0x9c8   :  { %v1992_v20 = vpop.f32.mrf.mxu0  ;;  %v2033_v42 = vpop.f32.mrf.mxu1 }
 0x9c9   :  { %3186 = vpow2.f32 %v2856_v37  ;;  %v2857_v2 = vmul.f32 -1.442695, %v2037_v57  ;;  %v2858_v56 = vmul.f32 -1.442695, %v2039_v10 }
 0x9ca   :  { %v1993_v63 = vpop.f32.mrf.mxu0  ;;  %v2034_v1 = vpop.f32.mrf.mxu1 }
 0x9cb   :  { %3188 = vpow2.f32 %v2857_v2 }
 0x9cc   :  { %3190 = vtanh.f32 %v2038_v14 }
 0x9cd   :  { %3192 = vpow2.f32 %v2858_v56 }
 0x9d6   :  { %v3187_v27 = vpop.eup %3186 }
 0x9d7   :  { %v2043_v49 = vadd.f32 1.0, %v3187_v27 }
 0x9d8   :  { %v3189_v26 = vpop.eup %3188 }
 0x9d9   :  { %3194 = vrcp.f32 %v2043_v49  ;;  %v2049_v0 = vadd.f32 1.0, %v3189_v26  ;;  %v3191_v43 = vpop.eup %3190 }
 0x9da   :  { %v3193_v29 = vpop.eup %3192 }
 0x9db   :  { %3196 = vrcp.f32 %v2049_v0  ;;  %v2056_v47 = vadd.f32 1.0, %v3193_v29 }
 0x9dd   :  { %3198 = vrcp.f32 %v2056_v47  ;;  %v3004_v47 = vld [vmem:[#allocation6 + $0x78] sm:$0xff]  }
 0x9e6   :  { %v3195_v19 = vpop.eup %3194 }
 0x9e7   :  { %v2060_v34 = vmul.f32 %v3195_v19, %v3191_v43 }
 0x9e8   :  { %v3197_v44 = vpop.eup %3196 }
 0x9e9   :  { %v2059_v40 = vmul.f32 %v3197_v44, %v4041_v35 }
 0x9ea   :  { %v3199_v3 = vpop.eup %3198 }
 0x9eb   :  { %v4083_v12 = vadd.f32 %v2060_v34, %v2059_v40  ;;  %v3005_v40 = vld [vmem:[#allocation6 + $0x38] sm:$0xff]  }
 0x9ed   :  { %3200 = vtanh.f32 %v4083_v12 }
 0x9fa   :  { %v3201_v16 = vpop.eup %3200 }
 0x9fb   :  { %v2063_v55 = vmul.f32 %v3201_v16, %v3199_v3  ;;  %v3007_v3 = vld [vmem:[#allocation6 + $0x30] sm:$0xff]   ;;  %v3008_v16 = vld [vmem:[#allocation6 + $0x68] sm:$0xff]  }
 0x9fd   :  { %v2068_v37 = vpack.c.bf16 %v2063_v55, %v2063_v55  ;;  %v3009_v55 = vld [vmem:[#allocation6 + $0x28] sm:$0xff]  }
 0x9ff   :  { %2102 = vmatmul.mubr.bf16.vlgmr.msra.gmra.mxu0 %v2068_v37  ;;  %2143 = vmatmul.mubr.bf16.vlgmr.msra.gmra.mxu1 %v2068_v37  ;;  %v3010_v37 = vld [vmem:[#allocation6 + $0x60] sm:$0xff]  }
 0xa00   :  { %2185 = vmatpush1.bf16.msra.mxu0 %v3428_v13  ;;  %2226 = vmatpush1.bf16.msra.mxu1 %v3434_v15  ;;  %v3244_v13 = vld [vmem:[#allocation3 + $0x310] sm:$0x11] }
 0xa01   :  { %2186 = vmatprep.subr.bf16.mxu0 %v3438_v18  ;;  %2227 = vmatprep.subr.bf16.mxu1 %v3445_v23  ;;  %v85_v15 = vunpack.c.h.bf16 %v3244_v13  ;;  %v3011_v13 = vld [vmem:[#allocation6 + $0x20] sm:$0xff]  }
 0xa02   :  { %2216 = vmatprep.mubr.bf16.mxu0 %v4203_v58  ;;  %2257 = vmatprep.mubr.bf16.mxu1 %v4203_v58 }
 0xa03   :  { %v123_v18 = vrot.slane %v85_v15, %v3547_v17  ;;  %v3012_v15 = vld [vmem:[#allocation6 + $0x58] sm:$0xff]  }
 0xa04   :  { %2187 = vmatpush1.bf16.msra.mxu0 %v3443_v21  ;;  %2228 = vmatpush1.bf16.msra.mxu1 %v3450_v24 }
 0xa05   :  { %2188 = vmatprep.subr.bf16.mxu0 %v3455_v28  ;;  %2229 = vmatprep.subr.bf16.mxu1 %v3461_v31  ;;  %v618_v21 = vadd.f32 %v3740_v48, %v123_v18  ;;  %v3013_v18 = vld [vmem:[#allocation6 + $0x18] sm:$0xff]  }
 0xa07   :  { %v2866_v23 = vmul.f32 -1.442695, %v618_v21  ;;  %v3014_v21 = vld [vmem:[#allocation6 + $0x50] sm:$0xff]  }
 0xa08   :  { %2189 = vmatpush1.bf16.msra.mxu0 %v3457_v30  ;;  %2230 = vmatpush1.bf16.msra.mxu1 %v3463_v32  ;;  %v3245_v30 = vld [vmem:[#allocation3 + $0x318] sm:$0x11] }
 0xa09   :  { %2190 = vmatprep.subr.bf16.mxu0 %v3469_v36  ;;  %2231 = vmatprep.subr.bf16.mxu1 %v3476_v39  ;;  %3202 = vpow2.f32 %v2866_v23  ;;  %v87_v31 = vunpack.c.h.bf16 %v3245_v30  ;;  %v4232_v32 = vld [vmem:[#allocation17_spill] sm:$0xff]  ;;  %v3018_v30 = vld [vmem:[#allocation6 + $0x40] sm:$0xff]  }
 0xa0a   :  { %v3015_v23 = vld [vmem:[#allocation6 + $0x10] sm:$0xff]  }
 0xa0c   :  { %2191 = vmatpush1.bf16.msra.mxu0 %v3474_v38  ;;  %2232 = vmatpush1.bf16.msra.mxu1 %v3478_v41 }
 0xa0d   :  { %2192 = vmatprep.subr.bf16.mxu0 %v3484_v45  ;;  %2233 = vmatprep.subr.bf16.mxu1 %v3493_v51  ;;  %v4233_v45 = vld [vmem:[#allocation18_spill] sm:$0xff] }
 0xa10   :  { %2193 = vmatpush1.bf16.msra.mxu0 %v3486_v46  ;;  %2234 = vmatpush1.bf16.msra.mxu1 %v3495_v52  ;;  %v131_v52 = vrot.slane %v87_v31, %v3547_v17  ;;  %v3019_v31 = vld [vmem:[#allocation6] sm:$0xff]  }
 0xa11   :  { %2194 = vmatprep.subr.bf16.mxu0 %v3489_v50  ;;  %2235 = vmatprep.subr.bf16.mxu1 %v3503_v22 }
 0xa14   :  { %2195 = vmatpush1.bf16.msra.mxu0 %v3500_v59  ;;  %2236 = vmatpush1.bf16.msra.mxu1 %v3509_v61 }
 0xa15   :  { %2196 = vmatprep.subr.bf16.mxu0 %v3507_v60  ;;  %2237 = vmatprep.subr.bf16.mxu1 %v3514_v62  ;;  %v711_v62 = vadd.f32 %v3738_v53, %v131_v52 }
 0xa16   :  { %v3203_v61 = vpop.eup %3202 }
 0xa18   :  { %2197 = vmatpush1.bf16.msra.mxu0 %v3518_v4  ;;  %2238 = vmatpush1.bf16.msra.mxu1 %v3524_v6  ;;  %v2307_v4 = vadd.f32 1.0, %v3203_v61  ;;  %v4237_v61 = vld [vmem:[#allocation20_spill] sm:$0xff] }
 0xa19   :  { %2198 = vmatprep.subr.bf16.mxu0 %v3522_v5  ;;  %2239 = vmatprep.subr.bf16.mxu1 %v3529_v7  ;;  %v4234_v5 = vld [vmem:[#allocation45_spill] sm:$0xff]  ;;  %v2867_v7 = vmul.f32 -1.442695, %v711_v62 }
 0xa1c   :  { %2199 = vmatpush1.bf16.msra.mxu0 %v3533_v8  ;;  %2240 = vmatpush1.bf16.msra.mxu1 %v3537_v9  ;;  %v4235_v8 = vld [vmem:[#allocation44_spill] sm:$0xff] }
 0xa1d   :  { %2900 = vmatprep.subr.bf16.mxu0 %v3004_v47  ;;  %v3031_v47 = vld [vmem:[#allocation6 + $0xe0] sm:$0xff]  }
 0xabf   :  { %v2103_v24 = vpop.f32.mrf.mxu0  ;;  %v2144_v28 = vpop.f32.mrf.mxu1 }
 0xac0   :  { %v2151_v36 = vadd.f32 %v2103_v24, %v4232_v32  ;;  %v2153_v9 = vadd.f32 %v2144_v28, %v4235_v8  ;;  %v3016_v24 = vld [vmem:[#allocation6 + $0x48] sm:$0xff]   ;;  %v3020_v32 = vld [vmem:[#allocation6 + $0xb8] sm:$0xff]  }
 0xac1   :  { %v2105_v38 = vpop.f32.mrf.mxu0  ;;  %v2146_v39 = vpop.f32.mrf.mxu1  ;;  %v3017_v28 = vld [vmem:[#allocation6 + $0x8] sm:$0xff]  }
 0xac2   :  { %v2859_v41 = vmul.f32 -1.442695, %v2151_v36  ;;  %v2152_v46 = vadd.f32 %v2105_v38, %v4233_v45  ;;  %v2154_v6 = vadd.f32 %v2146_v39, %v4234_v5  ;;  %v3319_v36 = vmov 0.0   ;;  %v3021_v38 = vld [vmem:[#allocation6 + $0xb0] sm:$0xff]   ;;  %v3022_v39 = vld [vmem:[#allocation6 + $0xa8] sm:$0xff]   ;;  %v3024_v45 = vld [vmem:[#allocation6 + $0x98] sm:$0xff]  }
 0xac3   :  { %v2107_v50 = vpop.f32.mrf.mxu0  ;;  %v2148_v51 = vpop.f32.mrf.mxu1  ;;  %2940 = vmatprep.subr.bf16.mxu1 %v3319_v36 }
 0xac4   :  { %3204 = vpow2.f32 %v2859_v41  ;;  %v2860_v59 = vmul.f32 -1.442695, %v2152_v46  ;;  %v2861_v58 = vmul.f32 -1.442695, %v2154_v6  ;;  %v3023_v41 = vld [vmem:[#allocation6 + $0xa0] sm:$0xff]  }
 0xac5   :  { %v2108_v22 = vpop.f32.mrf.mxu0  ;;  %v2149_v60 = vpop.f32.mrf.mxu1  ;;  %v4236_v51 = vld [vmem:[#allocation19_spill] sm:$0xff] }
 0xac6   :  { %3206 = vpow2.f32 %v2860_v59 }
 0xac7   :  { %3208 = vrcp.f32 %v2307_v4 }
 0xac8   :  { %3210 = vpow2.f32 %v2867_v7 }
 0xac9   :  { %3212 = vtanh.f32 %v2153_v9  ;;  %v4238_v9 = vld [vmem:[#allocation47_spill] sm:$0xff] }
 0xaca   :  { %3214 = vpow2.f32 %v2861_v58 }
 0xad1   :  { %v3205_v48 = vpop.eup %3204 }
 0xad2   :  { %v2158_v35 = vadd.f32 1.0, %v3205_v48  ;;  %v4239_v48 = vld [vmem:[#allocation46_spill] sm:$0xff] }
 0xad3   :  { %v3207_v54 = vpop.eup %3206 }
 0xad4   :  { %3216 = vrcp.f32 %v2158_v35  ;;  %v2164_v57 = vadd.f32 1.0, %v3207_v54  ;;  %v3209_v20 = vpop.eup %3208 }
 0xad5   :  { %v3211_v42 = vpop.eup %3210  ;;  %v2317_v53 = vmul.f32 0.0, %v3209_v20 }
 0xad6   :  { %3218 = vrcp.f32 %v2164_v57  ;;  %v3213_v2 = vpop.eup %3212  ;;  %v2314_v1 = vadd.f32 1.0, %v3211_v42 }
 0xad7   :  { %v3215_v63 = vpop.eup %3214  ;;  %v2319_v10 = vadd.f32 %v3736_v11, %v2317_v53 }
 0xad8   :  { %v2171_v56 = vadd.f32 1.0, %v3215_v63  ;;  %3220 = vrcp.f32 %v2314_v1 }
 0xad9   :  { %3222 = vtanh.f32 %v2319_v10 }
 0xada   :  { %3224 = vrcp.f32 %v2171_v56 }
 0xae1   :  { %v3217_v25 = vpop.eup %3216 }
 0xae2   :  { %v2175_v33 = vmul.f32 %v3217_v25, %v3213_v2 }
 0xae3   :  { %v3219_v14 = vpop.eup %3218 }
 0xae4   :  { %v2174_v27 = vmul.f32 %v3219_v14, %v4083_v12  ;;  %v3006_v12 = vld [vmem:[#allocation6 + $0x70] sm:$0xff]  }
 0xae5   :  { %v3221_v26 = vpop.eup %3220 }
 0xae6   :  { %v4128_v49 = vadd.f32 %v2175_v33, %v2174_v27  ;;  %v3223_v0 = vpop.eup %3222 }
 0xae7   :  { %v3225_v43 = vpop.eup %3224  ;;  %v2321_v19 = vmul.f32 %v3223_v0, %v3221_v26 }
 0xae8   :  { %3226 = vtanh.f32 %v4128_v49 }
 0xae9   :  { %v2389_v11 = vpack.c.bf16 %v2321_v19, %v2321_v19  ;;  %v3026_v19 = vld [vmem:[#allocation6 + $0x88] sm:$0xff]  }
 0xaf5   :  { %v3227_v29 = vpop.eup %3226 }
 0xaf6   :  { %v2178_v34 = vmul.f32 %v3227_v29, %v3225_v43  ;;  %v3025_v29 = vld [vmem:[#allocation6 + $0x90] sm:$0xff]  }
 0xaf8   :  { %v2183_v44 = vpack.c.bf16 %v2178_v34, %v2178_v34  ;;  %v3027_v34 = vld [vmem:[#allocation6 + $0x80] sm:$0xff]  }
 0xafa   :  { %2217 = vmatmul.mubr.bf16.vlgmr.msra.gmra.mxu0 %v2183_v44  ;;  %2258 = vmatmul.mubr.bf16.vlgmr.msra.gmra.mxu1 %v2183_v44  ;;  %v3029_v44 = vld [vmem:[#allocation6 + $0xf0] sm:$0xff]  }
 0xafb   :  { %2522 = vmatprep.mubr.bf16.mxu0 %v2389_v11  ;;  %2901 = vmatpush3.bf16.msra.mxu0 %v3005_v40  ;;  %v3030_v11 = vld [vmem:[#allocation6 + $0xe8] sm:$0xff]   ;;  %v3032_v40 = vld [vmem:[#allocation6 + $0xd8] sm:$0xff]  }
 0xafc   :  { %2902 = vmatprep.subr.bf16.mxu0 %v3006_v12  ;;  %2941 = vmatpush3.bf16.msra.mxu1 %v3020_v32  ;;  %v3033_v12 = vld [vmem:[#allocation6 + $0xd0] sm:$0xff]  }
 0xafd   :  { %2942 = vmatprep.subr.bf16.mxu1 %v3319_v36  ;;  %2956 = vmatprep.mubr.msk.bf16.mxu1 %vm3320_vm1, %v3319_v36  ;;  %v4240_v32 = vld [vmem:[#allocation12_spill] sm:$0xff] }
 0xaff   :  { %2903 = vmatpush3.bf16.msra.mxu0 %v3007_v3  ;;  %v2386_v3 = vld [vmem:[#allocation6 + $0x100] sm:$0x3] }
 0xb00   :  { %2904 = vmatprep.subr.bf16.mxu0 %v3008_v16  ;;  %2943 = vmatpush3.bf16.msra.mxu1 %v3021_v38  ;;  %v2387_v16 = vunpack.c.l.bf16 %v2386_v3  ;;  %v2534_v38 = vsub.s32 1, %v4240_v32 }
 0xb01   :  { %2944 = vmatprep.subr.bf16.mxu1 %v3319_v36 }
 0xb03   :  { %2905 = vmatpush3.bf16.msra.mxu0 %v3009_v55 }
 0xb04   :  { %2906 = vmatprep.subr.bf16.mxu0 %v3010_v37  ;;  %2945 = vmatpush3.bf16.msra.mxu1 %v3022_v39  ;;  %v2393_v37 = vrot.slane %v2387_v16, %v3547_v17  ;;  %v2535_v39 = vrot.slane %v2387_v16, %v2534_v38 }
 0xb05   :  { %2946 = vmatprep.subr.bf16.mxu1 %v3319_v36 }
 0xb07   :  { %2907 = vmatpush3.bf16.msra.mxu0 %v3011_v13 }
 0xb08   :  { %2908 = vmatprep.subr.bf16.mxu0 %v3012_v15  ;;  %2947 = vmatpush3.bf16.msra.mxu1 %v3023_v41 }
 0xb09   :  { %2948 = vmatprep.subr.bf16.mxu1 %v3319_v36 }
 0xb0b   :  { %2909 = vmatpush3.bf16.msra.mxu0 %v3013_v18 }
 0xb0c   :  { %2910 = vmatprep.subr.bf16.mxu0 %v3014_v21  ;;  %2949 = vmatpush3.bf16.msra.mxu1 %v3024_v45 }
 0xb0d   :  { %2950 = vmatprep.subr.bf16.mxu1 %v3319_v36 }
 0xb0f   :  { %2911 = vmatpush3.bf16.msra.mxu0 %v3015_v23 }
 0xb10   :  { %2912 = vmatprep.subr.bf16.mxu0 %v3016_v24  ;;  %2951 = vmatpush3.bf16.msra.mxu1 %v3025_v29 }
 0xb11   :  { %2952 = vmatprep.subr.bf16.mxu1 %v3319_v36 }
 0xb13   :  { %2913 = vmatpush3.bf16.msra.mxu0 %v3017_v28 }
 0xb14   :  { %2914 = vmatprep.subr.bf16.mxu0 %v3018_v30  ;;  %2953 = vmatpush3.bf16.msra.mxu1 %v3026_v19  ;;  %v3034_v30 = vld [vmem:[#allocation6 + $0xc8] sm:$0xff]  }
 0xb15   :  { %2954 = vmatprep.subr.bf16.mxu1 %v3319_v36 }
 0xb17   :  { %2915 = vmatpush3.bf16.msra.mxu0 %v3019_v31  ;;  %v3035_v31 = vld [vmem:[#allocation6 + $0xc0] sm:$0xff]  }
 0xb18   :  { %2960 = vmatprep.subr.bf16.mxu0 %v3319_v36  ;;  %2955 = vmatpush3.bf16.msra.mxu1 %v3027_v34 }
 0xbba   :  { %v2218_v46 = vpop.f32.mrf.mxu0  ;;  %v2259_v50 = vpop.f32.mrf.mxu1 }
 0xbbb   :  { %v2266_v52 = vadd.f32 %v2218_v46, %v4236_v51  ;;  %v2268_v35 = vadd.f32 %v2259_v50, %v4239_v48 }
 0xbbc   :  { %v2220_v59 = vpop.f32.mrf.mxu0  ;;  %v2261_v22 = vpop.f32.mrf.mxu1 }
 0xbbd   :  { %v2862_v60 = vmul.f32 -1.442695, %v2266_v52  ;;  %v2267_v62 = vadd.f32 %v2220_v59, %v4237_v61  ;;  %v2269_v58 = vadd.f32 %v2261_v22, %v4238_v9  ;;  %v2628_v59 = vsub.s32 2, %v4240_v32 }
 0xbbe   :  { %v2222_v4 = vpop.f32.mrf.mxu0  ;;  %v2263_v5 = vpop.f32.mrf.mxu1 }
 0xbbf   :  { %3228 = vpow2.f32 %v2862_v60  ;;  %v2863_v6 = vmul.f32 -1.442695, %v2267_v62  ;;  %v2864_v54 = vmul.f32 -1.442695, %v2269_v58  ;;  %v2629_v22 = vrot.slane %v2387_v16, %v2628_v59 }
 0xbc0   :  { %v2223_v7 = vpop.f32.mrf.mxu0  ;;  %v2264_v8 = vpop.f32.mrf.mxu1 }
 0xbc1   :  { %3230 = vpow2.f32 %v2863_v6 }
 0xbc2   :  { %3232 = vtanh.f32 %v2268_v35 }
 0xbc3   :  { %3234 = vpow2.f32 %v2864_v54 }
 0xbcc   :  { %v3229_v57 = vpop.eup %3228 }
 0xbcd   :  { %v2273_v20 = vadd.f32 1.0, %v3229_v57 }
 0xbce   :  { %v3231_v42 = vpop.eup %3230 }
 0xbcf   :  { %3236 = vrcp.f32 %v2273_v20  ;;  %v2279_v53 = vadd.f32 1.0, %v3231_v42  ;;  %v3233_v2 = vpop.eup %3232 }
 0xbd0   :  { %v3235_v63 = vpop.eup %3234 }
 0xbd1   :  { %3238 = vrcp.f32 %v2279_v53  ;;  %v2286_v33 = vadd.f32 1.0, %v3235_v63 }
 0xbd3   :  { %3240 = vrcp.f32 %v2286_v33 }
 0xbdc   :  { %v3237_v1 = vpop.eup %3236 }
 0xbdd   :  { %v2290_v25 = vmul.f32 %v3237_v1, %v3233_v2 }
 0xbde   :  { %v3239_v10 = vpop.eup %3238 }
 0xbdf   :  { %v2289_v14 = vmul.f32 %v3239_v10, %v4128_v49  ;;  %v3028_v49 = vld [vmem:[#allocation6 + $0xf8] sm:$0xff]  }
 0xbe0   :  { %v3241_v27 = vpop.eup %3240 }
 0xbe1   :  { %v2291_v56 = vadd.f32 %v2290_v25, %v2289_v14 }
 0xbe3   :  { %3242 = vtanh.f32 %v2291_v56 }
 0xbf0   :  { %v3243_v26 = vpop.eup %3242 }
 0xbf1   :  { %v2293_v0 = vmul.f32 %v3243_v26, %v3241_v27 }
 0xbf3   :  { %v2388_v43 = vpack.c.bf16 %v2293_v0, %v2293_v0 }
 0xbf5   :  { %2523 = vmatmul.mubr.bf16.vlgmr.msra.gmra.mxu0 %v2388_v43 }
 0xbf6   :  { %2976 = vmatprep.mubr.msk.bf16.mxu0 %vm3320_vm1, %v3319_v36  ;;  %2961 = vmatpush3.bf16.msra.mxu0 %v3028_v49 }
 0xbf7   :  { %2962 = vmatprep.subr.bf16.mxu0 %v3319_v36 }
 0xbfa   :  { %2963 = vmatpush3.bf16.msra.mxu0 %v3029_v44 }
 0xbfb   :  { %2964 = vmatprep.subr.bf16.mxu0 %v3319_v36 }
 0xbfe   :  { %2965 = vmatpush3.bf16.msra.mxu0 %v3030_v11 }
 0xbff   :  { %2966 = vmatprep.subr.bf16.mxu0 %v3319_v36 }
 0xc02   :  { %2967 = vmatpush3.bf16.msra.mxu0 %v3031_v47 }
 0xc03   :  { %2968 = vmatprep.subr.bf16.mxu0 %v3319_v36 }
 0xc06   :  { %2969 = vmatpush3.bf16.msra.mxu0 %v3032_v40 }
 0xc07   :  { %2970 = vmatprep.subr.bf16.mxu0 %v3319_v36 }
 0xc0a   :  { %2971 = vmatpush3.bf16.msra.mxu0 %v3033_v12 }
 0xc0b   :  { %2972 = vmatprep.subr.bf16.mxu0 %v3319_v36 }
 0xc0e   :  { %2973 = vmatpush3.bf16.msra.mxu0 %v3034_v30 }
 0xc0f   :  { %2974 = vmatprep.subr.bf16.mxu0 %v3319_v36 }
 0xc12   :  { %2975 = vmatpush3.bf16.msra.mxu0 %v3035_v31 }
 0xcb5   :  { %v2916_v55 = vpop.f32.mrf.mxu0 }
 0xcb7   :  { %v2917_v13 = vpop.f32.mrf.mxu0 }
 0xcb8   :  { %v2918_v15 = vadd.f32 %v2917_v13, %v2916_v55 }
 0xcb9   :  { %v2919_v18 = vpop.f32.mrf.mxu0 }
 0xcba   :  { %v2525_v21 = vadd.f32 %v2918_v15, %v2393_v37 }
 0xcbb   :  { %v2920_v23 = vpop.f32.mrf.mxu0 }
 0xcbc   :  { %v2530_v24 = vmax.f32 %v2525_v21, 0.0 }
 0xcbe   :  { %v2531_v28 = vpack.c.bf16 %v2530_v24, %v2530_v24 }
 0xcc0   :  { %2957 = vmatmul.mubr.bf16.vlgmr.msra.gmra.mxu1 %v2531_v28 }
 0xd80   :  { %v2618_v41 = vpop.f32.mrf.mxu1 }
 0xd81   :  { %v2619_v45 = vadd.f32 %v2618_v41, %v2535_v39 }
 0xd82   :  { %v2958_v17 = vpop.f32.mrf.mxu1 }
 0xd83   :  { %v2624_v46 = vmax.f32 %v2619_v45, 0.0 }
 0xd84   :  { %v2621_v50 = vpop.f32.mrf.mxu1 }
 0xd85   :  { %v2625_v51 = vpack.c.bf16 %v2624_v46, %v2624_v46 }
 0xd86   :  { %v2959_v52 = vpop.f32.mrf.mxu1 }
 0xd87   :  { %2977 = vmatmul.mubr.bf16.vlgmr.msra.gmra.mxu0 %v2625_v51 }
 0xe47   :  { %v2712_v60 = vpop.f32.mrf.mxu0 }
 0xe48   :  { %v2713_v36 = vadd.f32 %v2712_v60, %v2629_v22 }
 0xe49   :  { %v2978_v61 = vpop.f32.mrf.mxu0 }
 0xe4a   :  { %2718 = vst [vmem:[#allocation8] sm:$0xff] %v2713_v36 }
 0xe4b   :  { %v2715_v62 = vpop.f32.mrf.mxu0 }
 0xe4c   :  { %3297 = shalt.err (!%p3294_p0)
}
 0xe4d   :  { %2728 = dma.vmem_to_hbm [thread:$0]  %s2726_s9, 128, %s4163_s3, [#allocation5]   ;;  %v2979_v4 = vpop.f32.mrf.mxu0 }
 0xe4e   :  { %3310 = dma.done.wait [#allocation5], 128  }
 0xe4f   :  { %3311 = vsyncadd [#allocation5], 4294967168 }
 0xe50   :  { %2732 = vsyncpa [#allocation4], 1 }
 0xe51   :  { %2733 = vsyncpa [#allocation7], 1 }
 0xe52   :  { %2734 = vsyncpa [#allocation5], 1 }

</bundles_post_ra>
